<compile_context>
chip_gen: v5e
topology: v5e:2x2
jax: 0.10.0
libtpu: 0.0.40
codegen_flags: <defaults>
</compile_context>

<pallas_src>
import jax
import jax.numpy as jnp
from jax.experimental import pallas as pl
from jax.experimental.pallas import tpu as pltpu


def _round_up(x, m):
    return (x + m - 1) // m * m


def _device_kind():
    try:
        return jax.devices()[0].device_kind.lower()
    except Exception:  # pragma: no cover
        return ""


def _resnet_e_mlp_kernel(x_ref, w1_ref, w2_ref, w3_ref, o_ref):
    # Fused 3-layer MLP hot path: matmul -> relu -> matmul -> relu -> matmul.
    # bf16 operands, f32 MXU accumulation; intermediates go back to bf16 so the
    # next matmul stays on the bf16-native MXU path and vreg pressure is halved.
    h = jnp.dot(x_ref[...], w1_ref[...], preferred_element_type=jnp.float32)
    h = jnp.maximum(h, 0.0).astype(w2_ref.dtype)            # EBN1 = nn.ReLU()
    h = jnp.dot(h, w2_ref[...], preferred_element_type=jnp.float32)
    h = jnp.maximum(h, 0.0).astype(w3_ref.dtype)            # EBN2 = nn.ReLU()
    out = jnp.dot(h, w3_ref[...], preferred_element_type=jnp.float32)
    o_ref[...] = out.astype(o_ref.dtype)


def prepare_resnet_e_weights(w1, w2, w3, compute_dtype=jnp.bfloat16):
    """One-time parameter prep: cast to the MXU compute dtype and zero-pad the
    feature dims to multiples of 128 (lane-dense).  Call once and reuse the
    result across forward calls so this HBM traffic is not paid per call.

    w1 : (D_in, D_h)   Efc1 weight, stored as (in, out) (transposed vs PyTorch)
    w2 : (D_h,  D_h)   Efc2 weight
    w3 : (D_h,  D_out) Efc3 weight
    """
    cd = jnp.dtype(compute_dtype)
    D_in, D_h = w1.shape
    D_out = w3.shape[1]
    assert w2.shape == (D_h, D_h) and w3.shape[0] == D_h

    D_in_p = _round_up(D_in, 128)
    D_h_p = _round_up(D_h, 128)
    D_out_p = _round_up(D_out, 128)

    # Zero padding on the contraction (K) axes is required for correctness;
    # padding on the output (N) axes just produces extra columns we slice off.
    w1_p = jnp.pad(w1.astype(cd), ((0, D_in_p - D_in), (0, D_h_p - D_h)))
    w2_p = jnp.pad(w2.astype(cd), ((0, D_h_p - D_h), (0, D_h_p - D_h)))
    w3_p = jnp.pad(w3.astype(cd), ((0, D_h_p - D_h), (0, D_out_p - D_out)))

    return {
        "w1": w1_p, "w2": w2_p, "w3": w3_p,
        "dims": (D_in, D_h, D_out),
        "padded_dims": (D_in_p, D_h_p, D_out_p),
        "compute_dtype": cd,
    }


def resnet_e_forward(e, params, *, tb=None, out_dtype=None):
    """Pallas implementation of Resnet_E(Elayertofc=True).forward.

    e      : (B, D_in) activations
    params : output of prepare_resnet_e_weights (padded bf16 weights, cached)
    tb     : batch tile; default is chosen per chip (128 on v5e, 256 on v6e/v7x)
    out_dtype : output dtype; default keeps e.dtype (use bf16 if downstream
                consumers accept it to halve output HBM writes).
    """
    B, D_in = e.shape
    D_in_w, D_h, D_out = params["dims"]
    D_in_p, D_h_p, D_out_p = params["padded_dims"]
    cd = params["compute_dtype"]
    assert D_in == D_in_w, (D_in, D_in_w)
    out_dtype = jnp.dtype(e.dtype if out_dtype is None else out_dtype)

    kind = _device_kind()
    # --- per-chip batch tile: 128 fills v5e's 4x128x128 MXU; 256 fills the
    # 2x256x256 MXU on v6e/v7x.  Clamp for tiny batches (multiple of 16 keeps
    # bf16 sublane packing and f32 (8,.) output tiling legal).
    if tb is None:
        tb = 128 if "v5" in kind else 256
    tb = max(16, min(tb, _round_up(B, 16)))
    # v7x has 2 TensorCores: ensure >= 2 grid steps so "parallel" can shard.
    if ("v7" in kind) and B >= 32 and pl.cdiv(B, tb) < 2:
        tb = max(16, _round_up(pl.cdiv(B, 2), 16))
    grid_b = pl.cdiv(B, tb)

    # --- activations: cast to compute dtype; zero-pad only the K axis (needed
    # for correctness) and only when not already 128-aligned.  No batch
    # padding: partial last grid blocks only affect rows that are sliced off.
    e_c = e.astype(cd)
    e_p = e_c if D_in_p == D_in else jnp.pad(e_c, ((0, 0), (0, D_in_p - D_in)))

    # --- VMEM budget: single-buffered resident weights + double-buffered
    # x/out tiles + f32 intermediates, capped below physical VMEM.
    itm = cd.itemsize
    out_itm = out_dtype.itemsize
    weight_bytes = (D_in_p * D_h_p + D_h_p * D_h_p + D_h_p * D_out_p) * itm
    act_bytes = 2 * tb * D_in_p * itm + 2 * tb * D_out_p * out_itm
    scratch_bytes = 4 * tb * D_h_p * 4
    need = weight_bytes + act_bytes + scratch_bytes
    try:
        phys_vmem = int(pltpu.get_tpu_info().vmem_capacity_bytes)
    except Exception:  # pragma: no cover - conservative fallback (v7x size)
        phys_vmem = 64 * 1024 * 1024
    vmem_limit = max(32 * 1024 * 1024,
                     min(int(need * 1.25) + (2 << 20), phys_vmem - (2 << 20)))

    flops = 2 * B * (D_in_p * D_h_p + D_h_p * D_h_p + D_h_p * D_out_p)
    bytes_accessed = (e_p.size + params["w1"].size + params["w2"].size
                      + params["w3"].size) * itm + B * D_out_p * out_itm
    cost = pl.CostEstimate(flops=int(flops), transcendentals=0,
                           bytes_accessed=int(bytes_accessed))

    # TODO(synk): if the single-buffered weights ever exceed ~40 MB, add a K
    # grid axis over D_in with an f32 accumulator scratch for layer 1 instead
    # of keeping W1 fully resident.
    out_p = pl.pallas_call(
        _resnet_e_mlp_kernel,
        out_shape=jax.ShapeDtypeStruct((B, D_out_p), out_dtype),
        grid_spec=pltpu.PrefetchScalarGridSpec(
            num_scalar_prefetch=0,
            grid=(grid_b,),
            in_specs=[
                # batch-tiled activations (default double-buffered stream)
                pl.BlockSpec((tb, D_in_p), lambda i: (i, 0)),
                # loop-invariant weights: single-buffered, fetched once
                pl.BlockSpec((D_in_p, D_h_p), lambda i: (0, 0),
                             pipeline_mode=pl.Buffered(1)),
                pl.BlockSpec((D_h_p, D_h_p), lambda i: (0, 0),
                             pipeline_mode=pl.Buffered(1)),
                pl.BlockSpec((D_h_p, D_out_p), lambda i: (0, 0),
                             pipeline_mode=pl.Buffered(1)),
            ],
            out_specs=pl.BlockSpec((tb, D_out_p), lambda i: (i, 0)),
        ),
        compiler_params=pltpu.CompilerParams(
            dimension_semantics=("parallel",),
            vmem_limit_bytes=vmem_limit,
        ),
        cost_estimate=cost,
    )(e_p, params["w1"], params["w2"], params["w3"])

    # Strip feature padding (no batch padding to strip).
    return out_p[:, :D_out]


def resnet_e_reference(e, w1, w2, w3, compute_dtype=jnp.bfloat16):
    # Pure-JAX reference mirroring the kernel's precision pipeline
    # (bf16 operands, f32 accumulation).
    cd = jnp.dtype(compute_dtype)
    h = jnp.dot(e.astype(cd), w1.astype(cd), preferred_element_type=jnp.float32)
    h = jnp.maximum(h, 0.0).astype(cd)
    h = jnp.dot(h, w2.astype(cd), preferred_element_type=jnp.float32)
    h = jnp.maximum(h, 0.0).astype(cd)
    return jnp.dot(h, w3.astype(cd), preferred_element_type=jnp.float32)


if __name__ == "__main__":
    # Small shapes consistent with the module's structure
    # (Efc1: D_in -> D_h, Efc2/Efc3: D_h -> D_h; real module is
    #  10000->1000->1000->1000).  Deliberately NOT 128-aligned to exercise the
    #  feature-padding path, and B not a multiple of the batch tile to
    #  exercise the partial-block (cdiv grid) path.
    B, D_in, D_h = 8, 1000, 250

    key = jax.random.PRNGKey(0)
    k_e, k1, k2, k3 = jax.random.split(key, 4)

    e = jax.random.normal(k_e, (B, D_in), dtype=jnp.float32)
    # Deterministic weight init (Kaiming-uniform-like scale), stored as (in, out).
    w1 = jax.random.uniform(k1, (D_in, D_h), jnp.float32, -1.0, 1.0) / jnp.sqrt(D_in)
    w2 = jax.random.uniform(k2, (D_h, D_h), jnp.float32, -1.0, 1.0) / jnp.sqrt(D_h)
    w3 = jax.random.uniform(k3, (D_h, D_h), jnp.float32, -1.0, 1.0) / jnp.sqrt(D_h)

    # One-time weight prep (hoisted out of the per-call path), then forward.
    params = prepare_resnet_e_weights(w1, w2, w3)
    params = jax.tree_util.tree_map(
        lambda x: jax.block_until_ready(x) if isinstance(x, jax.Array) else x,
        params)

    out = resnet_e_forward(e, params)
    out = jax.block_until_ready(out)

    ref = resnet_e_reference(e, w1, w2, w3)
    assert out.shape == (B, D_h), out.shape
    # bf16 compute: compare against the precision-matched reference.
    assert jnp.allclose(out, ref, atol=1e-2, rtol=1e-2), "mismatch vs reference"

    print("KERNEL_OK")
</pallas_src>

<mosaic_0001>
module attributes {stable_mosaic.version = 11 : i64} {
  func.func @_resnet_e_mlp_kernel(%arg0: i32, %arg1: memref<16x1024xbf16, #tpu.memory_space<vmem>>, %arg2: memref<1024x256xbf16, #tpu.memory_space<vmem>>, %arg3: memref<256x256xbf16, #tpu.memory_space<vmem>>, %arg4: memref<256x256xbf16, #tpu.memory_space<vmem>>, %arg5: memref<16x256xf32, #tpu.memory_space<vmem>>) attributes {dimension_semantics = [#tpu.dimension_semantics<parallel>], iteration_bounds = array<i64: 1>, scalar_prefetch = 0 : i64, scratch_operands = 0 : i64, tpu.core_type = #tpu.core_type<tc>, window_params = [{transform_indices = @transform_0, window_bounds = array<i64: 16, 1024>}, {pipeline_mode = #tpu.pipeline_mode<synchronous>, transform_indices = @transform_1, window_bounds = array<i64: 1024, 256>}, {pipeline_mode = #tpu.pipeline_mode<synchronous>, transform_indices = @transform_2, window_bounds = array<i64: 256, 256>}, {pipeline_mode = #tpu.pipeline_mode<synchronous>, transform_indices = @transform_3, window_bounds = array<i64: 256, 256>}, {transform_indices = @transform_4, window_bounds = array<i64: 16, 256>}]} {
    %c0 = arith.constant 0 : index
    %c0_0 = arith.constant 0 : index
    %0 = vector.load %arg1[%c0, %c0_0] : memref<16x1024xbf16, #tpu.memory_space<vmem>>, vector<16x1024xbf16>
    %c0_1 = arith.constant 0 : index
    %c0_2 = arith.constant 0 : index
    %1 = vector.load %arg2[%c0_1, %c0_2] : memref<1024x256xbf16, #tpu.memory_space<vmem>>, vector<1024x256xbf16>
    %cst = arith.constant dense<0.000000e+00> : vector<16x256xf32>
    %2 = tpu.matmul %0, %1, %cst {dimension_numbers = #tpu.dot_dimension_numbers<[1], [0], [0], [1], [0, 0, 1, 1], [], []>} : vector<16x1024xbf16>, vector<1024x256xbf16>, vector<16x256xf32> -> vector<16x256xf32>
    %cst_3 = arith.constant 0.000000e+00 : f32
    %3 = vector.broadcast %cst_3 : f32 to vector<16x256xf32>
    %4 = arith.maximumf %2, %3 : vector<16x256xf32>
    %5 = arith.truncf %4 : vector<16x256xf32> to vector<16x256xbf16>
    %c0_4 = arith.constant 0 : index
    %c0_5 = arith.constant 0 : index
    %6 = vector.load %arg3[%c0_4, %c0_5] : memref<256x256xbf16, #tpu.memory_space<vmem>>, vector<256x256xbf16>
    %cst_6 = arith.constant dense<0.000000e+00> : vector<16x256xf32>
    %7 = tpu.matmul %5, %6, %cst_6 {dimension_numbers = #tpu.dot_dimension_numbers<[1], [0], [0], [1], [0, 0, 1, 1], [], []>} : vector<16x256xbf16>, vector<256x256xbf16>, vector<16x256xf32> -> vector<16x256xf32>
    %cst_7 = arith.constant 0.000000e+00 : f32
    %8 = vector.broadcast %cst_7 : f32 to vector<16x256xf32>
    %9 = arith.maximumf %7, %8 : vector<16x256xf32>
    %10 = arith.truncf %9 : vector<16x256xf32> to vector<16x256xbf16>
    %c0_8 = arith.constant 0 : index
    %c0_9 = arith.constant 0 : index
    %11 = vector.load %arg4[%c0_8, %c0_9] : memref<256x256xbf16, #tpu.memory_space<vmem>>, vector<256x256xbf16>
    %cst_10 = arith.constant dense<0.000000e+00> : vector<16x256xf32>
    %12 = tpu.matmul %10, %11, %cst_10 {dimension_numbers = #tpu.dot_dimension_numbers<[1], [0], [0], [1], [0, 0, 1, 1], [], []>} : vector<16x256xbf16>, vector<256x256xbf16>, vector<16x256xf32> -> vector<16x256xf32>
    %c0_11 = arith.constant 0 : index
    %c0_12 = arith.constant 0 : index
    %13 = vector.load %arg5[%c0_11, %c0_12] : memref<16x256xf32, #tpu.memory_space<vmem>>, vector<16x256xf32>
    tpu.vector_store %arg5[%c0_11, %c0_12], %12 {strides = array<i32>} : memref<16x256xf32, #tpu.memory_space<vmem>>, vector<16x256xf32>,
    return
  }
  func.func @transform_0(%arg0: i32) -> (i32, i32) {
    %c0_i32 = arith.constant 0 : i32
    %c0_i32_0 = arith.constant 0 : i32
    return %arg0, %c0_i32 : i32, i32
  }
  func.func @transform_1(%arg0: i32) -> (i32, i32) {
    %c0_i32 = arith.constant 0 : i32
    %c0_i32_0 = arith.constant 0 : i32
    %c0_i32_1 = arith.constant 0 : i32
    return %c0_i32, %c0_i32_0 : i32, i32
  }
  func.func @transform_2(%arg0: i32) -> (i32, i32) {
    %c0_i32 = arith.constant 0 : i32
    %c0_i32_0 = arith.constant 0 : i32
    %c0_i32_1 = arith.constant 0 : i32
    return %c0_i32, %c0_i32_0 : i32, i32
  }
  func.func @transform_3(%arg0: i32) -> (i32, i32) {
    %c0_i32 = arith.constant 0 : i32
    %c0_i32_0 = arith.constant 0 : i32
    %c0_i32_1 = arith.constant 0 : i32
    return %c0_i32, %c0_i32_0 : i32, i32
  }
  func.func @transform_4(%arg0: i32) -> (i32, i32) {
    %c0_i32 = arith.constant 0 : i32
    %c0_i32_0 = arith.constant 0 : i32
    return %arg0, %c0_i32 : i32, i32
  }
}

</mosaic_0001>

<bundles_post_ra>
// kernel: tpu_custom_call.1
= control target key start
LH: loop header
LB: loop body
LE: loop exit
PB: predicated region body
PF: predicated region fallthrough
CT: control target
= control target key end

     0   :  { %9 = vsyncpa [#allocation3], 0  ;;  %s2876_s0 = inlined_call_operand.hbm [shape: bf16[8,1024], index: 0, kind: input, shape index: {}]   ;;  %s2877_s1 = inlined_call_operand.hbm [shape: bf16[1024,256], index: 1, kind: input, shape index: {}]   ;;  %s2878_s2 = inlined_call_operand.hbm [shape: bf16[256,256], index: 2, kind: input, shape index: {}]   ;;  %s2879_s3 = inlined_call_operand.hbm [shape: bf16[256,256], index: 3, kind: input, shape index: {}]   ;;  %s2880_s4 = inlined_call_operand.hbm [shape: f32[8,256], index: 4, kind: output, shape index: {}]  }
   0x1   :  { %10 = vsyncpa [#allocation6], 0 }
   0x2   :  { %11 = vsyncpa [#allocation9], 0 }
   0x3   :  { %12 = vsyncpa [#allocation4], 0  ;;  %s30_s17 = sshll.u32 %s2877_s1, 4  ;;  %s31_s17 = int_to_ptr.hbm [resolvable:$true] %s30_s17 }
   0x4   :  { %16 = vsyncadd [#allocation3], 512  ;;  %s2793_s18 = smov [#allocation5]   ;;  %s17_s22 = sshll.u32 %s2876_s0, 4  ;;  %s18_s22 = int_to_ptr.hbm [resolvable:$true] %s17_s22 }
   0x5   :  { %s32_s19 = sshll.u32 %s2793_s18, 4  ;;  %s2794_s23 = smov 128   ;;  %s33_s19 = int_to_ptr.vmem [resolvable:$true] %s32_s19 }
   0x6   :  { %s2795_s24 = smov 8   ;;  %s2796_s25 = smov [#allocation2]  }
   0x7   :  { %38 = dma.hbm_to_vmem [thread:$0]  %s31_s17, 16384, %s33_s19, [#allocation6], %s2794_s23, %s2794_s23, %s2795_s24  }
   0x8   :  { %s19_s26 = sshll.u32 %s2796_s25, 4  ;;  %s2797_s27 = smov 512   ;;  %s20_s26 = int_to_ptr.vmem [resolvable:$true] %s19_s26 }
   0x9   :  { %s2798_s28 = smov 32   ;;  %s43_s30 = sshll.u32 %s2878_s2, 4  ;;  %s44_s30 = int_to_ptr.hbm [resolvable:$true] %s43_s30 }
   0xa   :  { %25 = dma.hbm_to_vmem [thread:$0]  %s18_s22, 512, %s20_s26, [#allocation3], %s2797_s27, %s2797_s27, %s2798_s28  }
   0xb   :  { %s2799_s5 = smov [#allocation7]   ;;  %s56_s8 = sshll.u32 %s2879_s3, 4  ;;  %s57_s8 = int_to_ptr.hbm [resolvable:$true] %s56_s8 }
   0xc   :  { %s45_s6 = sshll.u32 %s2799_s5, 4  ;;  %s2800_s9 = smov [#allocation8]   ;;  %s46_s6 = int_to_ptr.vmem [resolvable:$true] %s45_s6 }
   0xd   :  { %51 = dma.hbm_to_vmem [thread:$0]  %s44_s30, 4096, %s46_s6, [#allocation6], %s2794_s23, %s2794_s23, %s2795_s24  }
   0xe   :  { %s58_s10 = sshll.u32 %s2800_s9, 4  ;;  %s59_s10 = int_to_ptr.vmem [resolvable:$true] %s58_s10 }
   0xf   :  { %64 = dma.hbm_to_vmem [thread:$0]  %s57_s8, 4096, %s59_s10, [#allocation9], %s2794_s23, %s2794_s23, %s2795_s24  }
  0x10   :  { %2785 = dma.done.wait [#allocation3], 1024  }
  0x11   :  { %2786 = vsyncadd [#allocation3], 4294966272 }
  0x12   :  { %2787 = dma.done.wait [#allocation6], 20480  }
  0x13   :  { %2788 = vsyncadd [#allocation6], 4294946816 }
  0x14   :  { %2789 = dma.done.wait [#allocation9], 4096  }
  0x15   :  { %2790 = vsyncadd [#allocation9], 4294963200  ;;  %v1744_v0 = vld [vmem:[#allocation5 + $0x70] sm:$0xf]  ;;  %v2477_v1 = vld [vmem:[#allocation5 + $0x74] sm:$0xf0] }
  0x16   :  { %v1808_v2 = vld [vmem:[#allocation5 + $0xf0] sm:$0xf]  ;;  %v1745_v3 = vor.u32 %v2477_v1, %v1744_v0  ;;  %v2493_v4 = vld [vmem:[#allocation5 + $0xf4] sm:$0xf0]  ;;  %v1736_v11 = vld [vmem:[#allocation5 + $0x60] sm:$0xf] }
  0x17   :  { %v1872_v5 = vld [vmem:[#allocation5 + $0x170] sm:$0xf]  ;;  %v2509_v6 = vld [vmem:[#allocation5 + $0x174] sm:$0xf0]  ;;  %v1809_v7 = vor.u32 %v2493_v4, %v1808_v2  ;;  %v2475_v13 = vld [vmem:[#allocation5 + $0x64] sm:$0xf0] }
  0x18   :  { %v1873_v8 = vor.u32 %v2509_v6, %v1872_v5  ;;  %v1936_v9 = vld [vmem:[#allocation5 + $0x1f0] sm:$0xf]  ;;  %v2525_v10 = vld [vmem:[#allocation5 + $0x1f4] sm:$0xf0]  ;;  %897 = vmatpush.bf16.msra.mxu0 %v1745_v3  ;;  %v1800_v14 = vld [vmem:[#allocation5 + $0xe0] sm:$0xf]  ;;  %v1737_v16 = vor.u32 %v2475_v13, %v1736_v11 }
  0x19   :  { %v1937_v12 = vor.u32 %v2525_v10, %v1936_v9  ;;  %v2491_v15 = vld [vmem:[#allocation5 + $0xe4] sm:$0xf0]  ;;  %911 = vmatpush.bf16.msra.mxu1 %v1809_v7  ;;  %v1864_v18 = vld [vmem:[#allocation5 + $0x160] sm:$0xf]  ;;  %v1728_v23 = vld [vmem:[#allocation5 + $0x50] sm:$0xf] }
  0x1a   :  { %925 = vmatpush.bf16.msra.mxu2 %v1873_v8  ;;  %v1801_v17 = vor.u32 %v2491_v15, %v1800_v14  ;;  %v2507_v19 = vld [vmem:[#allocation5 + $0x164] sm:$0xf0]  ;;  %v1928_v20 = vld [vmem:[#allocation5 + $0x1e0] sm:$0xf]  ;;  %v2473_v24 = vld [vmem:[#allocation5 + $0x54] sm:$0xf0] }
  0x1b   :  { %939 = vmatpush.bf16.msra.mxu3 %v1937_v12  ;;  %v1865_v21 = vor.u32 %v2507_v19, %v1864_v18  ;;  %v2523_v22 = vld [vmem:[#allocation5 + $0x1e4] sm:$0xf0]  ;;  %v1792_v26 = vld [vmem:[#allocation5 + $0xd0] sm:$0xf]  ;;  %v2489_v27 = vld [vmem:[#allocation5 + $0xd4] sm:$0xf0]  ;;  %v1729_v29 = vor.u32 %v2473_v24, %v1728_v23 }
  0x1c   :  { %v1929_v25 = vor.u32 %v2523_v22, %v1928_v20  ;;  %v1856_v28 = vld [vmem:[#allocation5 + $0x150] sm:$0xf]  ;;  %898 = vmatpush.bf16.msra.mxu0 %v1737_v16  ;;  %v2505_v30 = vld [vmem:[#allocation5 + $0x154] sm:$0xf0]  ;;  %v1793_v33 = vor.u32 %v2489_v27, %v1792_v26  ;;  %v1720_v35 = vld [vmem:[#allocation5 + $0x40] sm:$0xf] }
  0x1d   :  { %v1920_v31 = vld [vmem:[#allocation5 + $0x1d0] sm:$0xf]  ;;  %v2521_v32 = vld [vmem:[#allocation5 + $0x1d4] sm:$0xf0]  ;;  %912 = vmatpush.bf16.msra.mxu1 %v1801_v17  ;;  %v1857_v34 = vor.u32 %v2505_v30, %v1856_v28  ;;  %v2471_v36 = vld [vmem:[#allocation5 + $0x44] sm:$0xf0] }
  0x1e   :  { %926 = vmatpush.bf16.msra.mxu2 %v1865_v21  ;;  %v1784_v37 = vld [vmem:[#allocation5 + $0xc0] sm:$0xf]  ;;  %v1921_v38 = vor.u32 %v2521_v32, %v1920_v31  ;;  %v2487_v39 = vld [vmem:[#allocation5 + $0xc4] sm:$0xf0]  ;;  %v1721_v44 = vor.u32 %v2471_v36, %v1720_v35  ;;  %v1712_v47 = vld [vmem:[#allocation5 + $0x30] sm:$0xf] }
  0x1f   :  { %940 = vmatpush.bf16.msra.mxu3 %v1929_v25  ;;  %v1848_v40 = vld [vmem:[#allocation5 + $0x140] sm:$0xf]  ;;  %v2503_v41 = vld [vmem:[#allocation5 + $0x144] sm:$0xf0]  ;;  %v1785_v45 = vor.u32 %v2487_v39, %v1784_v37  ;;  %v2469_v48 = vld [vmem:[#allocation5 + $0x34] sm:$0xf0] }
  0x20   :  { %v1912_v42 = vld [vmem:[#allocation5 + $0x1c0] sm:$0xf]  ;;  %v2519_v43 = vld [vmem:[#allocation5 + $0x1c4] sm:$0xf0]  ;;  %899 = vmatpush.bf16.msra.mxu0 %v1729_v29  ;;  %v1849_v46 = vor.u32 %v2503_v41, %v1848_v40  ;;  %v1776_v49 = vld [vmem:[#allocation5 + $0xb0] sm:$0xf]  ;;  %v1713_v56 = vor.u32 %v2469_v48, %v1712_v47 }
  0x21   :  { %913 = vmatpush.bf16.msra.mxu1 %v1793_v33  ;;  %v1913_v50 = vor.u32 %v2519_v43, %v1912_v42  ;;  %v2485_v51 = vld [vmem:[#allocation5 + $0xb4] sm:$0xf0]  ;;  %v1840_v52 = vld [vmem:[#allocation5 + $0x130] sm:$0xf]  ;;  %v1704_v59 = vld [vmem:[#allocation5 + $0x20] sm:$0xf] }
  0x22   :  { %927 = vmatpush.bf16.msra.mxu2 %v1857_v34  ;;  %v2501_v53 = vld [vmem:[#allocation5 + $0x134] sm:$0xf0]  ;;  %v1904_v54 = vld [vmem:[#allocation5 + $0x1b0] sm:$0xf]  ;;  %v1777_v57 = vor.u32 %v2485_v51, %v1776_v49  ;;  %v2467_v60 = vld [vmem:[#allocation5 + $0x24] sm:$0xf0] }
  0x23   :  { %941 = vmatpush.bf16.msra.mxu3 %v1921_v38  ;;  %v2517_v55 = vld [vmem:[#allocation5 + $0x1b4] sm:$0xf0]  ;;  %v1841_v58 = vor.u32 %v2501_v53, %v1840_v52  ;;  %v1768_v61 = vld [vmem:[#allocation5 + $0xa0] sm:$0xf]  ;;  %v2483_v63 = vld [vmem:[#allocation5 + $0xa4] sm:$0xf0]  ;;  %v1705_v4 = vor.u32 %v2467_v60, %v1704_v59 }
  0x24   :  { %900 = vmatpush.bf16.msra.mxu0 %v1721_v44  ;;  %v1905_v62 = vor.u32 %v2517_v55, %v1904_v54  ;;  %v1832_v0 = vld [vmem:[#allocation5 + $0x120] sm:$0xf]  ;;  %v2499_v1 = vld [vmem:[#allocation5 + $0x124] sm:$0xf0]  ;;  %v1769_v5 = vor.u32 %v2483_v63, %v1768_v61  ;;  %v1696_v7 = vld [vmem:[#allocation5 + $0x10] sm:$0xf] }
  0x25   :  { %914 = vmatpush.bf16.msra.mxu1 %v1785_v45  ;;  %v1896_v2 = vld [vmem:[#allocation5 + $0x1a0] sm:$0xf]  ;;  %v2515_v3 = vld [vmem:[#allocation5 + $0x1a4] sm:$0xf0]  ;;  %v1833_v6 = vor.u32 %v2499_v1, %v1832_v0  ;;  %v2465_v8 = vld [vmem:[#allocation5 + $0x14] sm:$0xf0] }
  0x26   :  { %928 = vmatpush.bf16.msra.mxu2 %v1849_v46  ;;  %v1760_v9 = vld [vmem:[#allocation5 + $0x90] sm:$0xf]  ;;  %v1897_v10 = vor.u32 %v2515_v3, %v1896_v2  ;;  %v2481_v11 = vld [vmem:[#allocation5 + $0x94] sm:$0xf0]  ;;  %v1697_v16 = vor.u32 %v2465_v8, %v1696_v7  ;;  %v1688_v17 = vld [vmem:[#allocation5] sm:$0xf] }
  0x27   :  { %942 = vmatpush.bf16.msra.mxu3 %v1913_v50  ;;  %v1824_v12 = vld [vmem:[#allocation5 + $0x110] sm:$0xf]  ;;  %v2497_v13 = vld [vmem:[#allocation5 + $0x114] sm:$0xf0]  ;;  %v2463_v18 = vld [vmem:[#allocation5 + $0x4] sm:$0xf0]  ;;  %v1761_v19 = vor.u32 %v2481_v11, %v1760_v9 }
  0x28   :  { %901 = vmatpush.bf16.msra.mxu0 %v1713_v56  ;;  %v1888_v14 = vld [vmem:[#allocation5 + $0x190] sm:$0xf]  ;;  %v2513_v15 = vld [vmem:[#allocation5 + $0x194] sm:$0xf0]  ;;  %v1825_v20 = vor.u32 %v2497_v13, %v1824_v12  ;;  %v1752_v21 = vld [vmem:[#allocation5 + $0x80] sm:$0xf]  ;;  %v1689_v31 = vor.u32 %v2463_v18, %v1688_v17 }
  0x29   :  { %915 = vmatpush.bf16.msra.mxu1 %v1777_v57  ;;  %v2479_v22 = vld [vmem:[#allocation5 + $0x84] sm:$0xf0]  ;;  %v1816_v23 = vld [vmem:[#allocation5 + $0x100] sm:$0xf]  ;;  %v1889_v24 = vor.u32 %v2513_v15, %v1888_v14  ;;  %v2000_v28 = vld [vmem:[#allocation5 + $0x270] sm:$0xf] }
  0x2a   :  { %929 = vmatpush.bf16.msra.mxu2 %v1841_v58  ;;  %v2495_v25 = vld [vmem:[#allocation5 + $0x104] sm:$0xf0]  ;;  %v1880_v26 = vld [vmem:[#allocation5 + $0x180] sm:$0xf]  ;;  %v2541_v29 = vld [vmem:[#allocation5 + $0x274] sm:$0xf0]  ;;  %v1753_v35 = vor.u32 %v2479_v22, %v1752_v21 }
  0x2b   :  { %943 = vmatpush.bf16.msra.mxu3 %v1905_v62  ;;  %v2511_v27 = vld [vmem:[#allocation5 + $0x184] sm:$0xf0]  ;;  %v2064_v30 = vld [vmem:[#allocation5 + $0x2f0] sm:$0xf]  ;;  %v2557_v32 = vld [vmem:[#allocation5 + $0x2f4] sm:$0xf0]  ;;  %v1817_v36 = vor.u32 %v2495_v25, %v1816_v23  ;;  %v2001_v40 = vor.u32 %v2541_v29, %v2000_v28 }
  0x2c   :  { %902 = vmatpush.bf16.msra.mxu0 %v1705_v4  ;;  %v2128_v33 = vld [vmem:[#allocation5 + $0x370] sm:$0xf]  ;;  %v2573_v34 = vld [vmem:[#allocation5 + $0x374] sm:$0xf0]  ;;  %v1881_v39 = vor.u32 %v2511_v27, %v1880_v26  ;;  %v1992_v41 = vld [vmem:[#allocation5 + $0x260] sm:$0xf]  ;;  %v2065_v43 = vor.u32 %v2557_v32, %v2064_v30 }
  0x2d   :  { %916 = vmatpush.bf16.msra.mxu1 %v1769_v5  ;;  %v2192_v37 = vld [vmem:[#allocation5 + $0x3f0] sm:$0xf]  ;;  %v2589_v38 = vld [vmem:[#allocation5 + $0x3f4] sm:$0xf0]  ;;  %v2539_v42 = vld [vmem:[#allocation5 + $0x264] sm:$0xf0]  ;;  %v2129_v44 = vor.u32 %v2573_v34, %v2128_v33 }
  0x2e   :  { %930 = vmatpush.bf16.msra.mxu2 %v1833_v6  ;;  %v2056_v45 = vld [vmem:[#allocation5 + $0x2e0] sm:$0xf]  ;;  %v2555_v46 = vld [vmem:[#allocation5 + $0x2e4] sm:$0xf0]  ;;  %v2193_v48 = vor.u32 %v2589_v38, %v2192_v37  ;;  %v1993_v55 = vor.u32 %v2539_v42, %v1992_v41  ;;  %v1984_v56 = vld [vmem:[#allocation5 + $0x250] sm:$0xf] }
  0x2f   :  { %944 = vmatpush.bf16.msra.mxu3 %v1897_v10  ;;  %v2120_v47 = vld [vmem:[#allocation5 + $0x360] sm:$0xf]  ;;  %v2571_v49 = vld [vmem:[#allocation5 + $0x364] sm:$0xf0]  ;;  %v2537_v57 = vld [vmem:[#allocation5 + $0x254] sm:$0xf0]  ;;  %v2057_v60 = vor.u32 %v2555_v46, %v2056_v45 }
  0x30   :  { %903 = vmatpush.bf16.msra.mxu0 %v1697_v16  ;;  %v2184_v50 = vld [vmem:[#allocation5 + $0x3e0] sm:$0xf]  ;;  %v2587_v51 = vld [vmem:[#allocation5 + $0x3e4] sm:$0xf0]  ;;  %v2121_v61 = vor.u32 %v2571_v49, %v2120_v47  ;;  %v2048_v62 = vld [vmem:[#allocation5 + $0x2d0] sm:$0xf]  ;;  %v1985_v9 = vor.u32 %v2537_v57, %v1984_v56 }
  0x31   :  { %917 = vmatpush.bf16.msra.mxu1 %v1761_v19  ;;  %v1656_v52 = vld [vmem:[#allocation2] sm:$0xf]  ;;  %v1664_v54 = vld [vmem:[#allocation2 + $0x8] sm:$0xf]  ;;  %v2553_v63 = vld [vmem:[#allocation5 + $0x2d4] sm:$0xf0]  ;;  %v2185_v2 = vor.u32 %v2587_v51, %v2184_v50 }
  0x32   :  { %931 = vmatpush.bf16.msra.mxu2 %v1825_v20  ;;  %v2458_v53 = vld [vmem:[#allocation2 + $0x1c] sm:$0xf0]  ;;  %v2459_v59 = vld [vmem:[#allocation2 + $0x24] sm:$0xf0]  ;;  %v2112_v0 = vld [vmem:[#allocation5 + $0x350] sm:$0xf]  ;;  %v2049_v12 = vor.u32 %v2553_v63, %v2048_v62 }
  0x33   :  { %945 = vmatpush.bf16.msra.mxu3 %v1889_v24  ;;  %v2841_v58 = vor.u32 %v2458_v53, %v1656_v52  ;;  %v2843_v1 = vor.u32 %v2459_v59, %v1664_v54  ;;  %v2569_v3 = vld [vmem:[#allocation5 + $0x354] sm:$0xf0]  ;;  %v2176_v4 = vld [vmem:[#allocation5 + $0x3d0] sm:$0xf]  ;;  %v2454_v6 = vld [vmem:[#allocation2 + $0x4] sm:$0xf] }
  0x34   :  { %904 = vmatpush.bf16.msra.mxu0 %v1689_v31  ;;  %v2585_v5 = vld [vmem:[#allocation5 + $0x3d4] sm:$0xf0]  ;;  %v1658_v7 = vld [vmem:[#allocation2 + $0x20] sm:$0xf0]  ;;  %v2455_v8 = vld [vmem:[#allocation2 + $0xc] sm:$0xf]  ;;  %v2113_v13 = vor.u32 %v2569_v3, %v2112_v0 }
  0x35   :  { %918 = vmatpush.bf16.msra.mxu1 %v1753_v35  ;;  %v2847_v10 = vor.u32 %v2454_v6, %v1658_v7  ;;  %v1666_v11 = vld [vmem:[#allocation2 + $0x28] sm:$0xf0]  ;;  %v1976_v14 = vld [vmem:[#allocation5 + $0x240] sm:$0xf]  ;;  %v2535_v15 = vld [vmem:[#allocation5 + $0x244] sm:$0xf0]  ;;  %v2177_v18 = vor.u32 %v2585_v5, %v2176_v4 }
  0x36   :  { %932 = vmatpush.bf16.msra.mxu2 %v1817_v36  ;;  %v2040_v16 = vld [vmem:[#allocation5 + $0x2c0] sm:$0xf]  ;;  %v2849_v17 = vor.u32 %v2455_v8, %v1666_v11  ;;  %v2551_v19 = vld [vmem:[#allocation5 + $0x2c4] sm:$0xf0]  ;;  %v1977_v24 = vor.u32 %v2535_v15, %v1976_v14  ;;  %v1968_v27 = vld [vmem:[#allocation5 + $0x230] sm:$0xf] }
  0x37   :  { %946 = vmatpush.bf16.msra.mxu3 %v1881_v39  ;;  %905 = vmatmul.bf16.vlgmr.msra.gmra.mxu0 %v2841_v58  ;;  %v2104_v20 = vld [vmem:[#allocation5 + $0x340] sm:$0xf]  ;;  %v2567_v21 = vld [vmem:[#allocation5 + $0x344] sm:$0xf0]  ;;  %v2041_v25 = vor.u32 %v2551_v19, %v2040_v16  ;;  %v2533_v28 = vld [vmem:[#allocation5 + $0x234] sm:$0xf0] }
  0x38   :  { %953 = vmatpush.bf16.msrb.mxu0 %v2001_v40  ;;  %919 = vmatmul.bf16.vlgmr.msra.gmra.mxu1 %v2847_v10  ;;  %v2168_v22 = vld [vmem:[#allocation5 + $0x3c0] sm:$0xf]  ;;  %v2583_v23 = vld [vmem:[#allocation5 + $0x3c4] sm:$0xf0]  ;;  %v2105_v26 = vor.u32 %v2567_v21, %v2104_v20  ;;  %v2032_v29 = vld [vmem:[#allocation5 + $0x2b0] sm:$0xf]  ;;  %v1969_v36 = vor.u32 %v2533_v28, %v1968_v27 }
  0x39   :  { %967 = vmatpush.bf16.msrb.mxu1 %v2065_v43  ;;  %933 = vmatmul.bf16.vlgmr.msra.gmra.mxu2 %v2843_v1  ;;  %v2169_v30 = vor.u32 %v2583_v23, %v2168_v22  ;;  %v2549_v31 = vld [vmem:[#allocation5 + $0x2b4] sm:$0xf0]  ;;  %v2096_v32 = vld [vmem:[#allocation5 + $0x330] sm:$0xf]  ;;  %v1960_v39 = vld [vmem:[#allocation5 + $0x220] sm:$0xf] }
  0x3a   :  { %981 = vmatpush.bf16.msrb.mxu2 %v2129_v44  ;;  %947 = vmatmul.bf16.vlgmr.msra.gmra.mxu3 %v2849_v17  ;;  %v2565_v33 = vld [vmem:[#allocation5 + $0x334] sm:$0xf0]  ;;  %v2160_v34 = vld [vmem:[#allocation5 + $0x3b0] sm:$0xf]  ;;  %v2033_v37 = vor.u32 %v2549_v31, %v2032_v29  ;;  %v2531_v40 = vld [vmem:[#allocation5 + $0x224] sm:$0xf0] }
  0x3b   :  { %995 = vmatpush.bf16.msrb.mxu3 %v2193_v48  ;;  %v2581_v35 = vld [vmem:[#allocation5 + $0x3b4] sm:$0xf0]  ;;  %v2097_v38 = vor.u32 %v2565_v33, %v2096_v32  ;;  %v2024_v41 = vld [vmem:[#allocation5 + $0x2a0] sm:$0xf]  ;;  %v2547_v43 = vld [vmem:[#allocation5 + $0x2a4] sm:$0xf0]  ;;  %v1961_v48 = vor.u32 %v2531_v40, %v1960_v39 }
  0x3c   :  { %954 = vmatpush.bf16.msrb.mxu0 %v1993_v55  ;;  %v2161_v42 = vor.u32 %v2581_v35, %v2160_v34  ;;  %v2088_v44 = vld [vmem:[#allocation5 + $0x320] sm:$0xf]  ;;  %v2563_v45 = vld [vmem:[#allocation5 + $0x324] sm:$0xf0]  ;;  %v1952_v49 = vld [vmem:[#allocation5 + $0x210] sm:$0xf]  ;;  %v2025_v50 = vor.u32 %v2547_v43, %v2024_v41 }
  0x3d   :  { %968 = vmatpush.bf16.msrb.mxu1 %v2057_v60  ;;  %v2152_v46 = vld [vmem:[#allocation5 + $0x3a0] sm:$0xf]  ;;  %v2579_v47 = vld [vmem:[#allocation5 + $0x3a4] sm:$0xf0]  ;;  %v2089_v51 = vor.u32 %v2563_v45, %v2088_v44  ;;  %v2529_v52 = vld [vmem:[#allocation5 + $0x214] sm:$0xf0] }
  0x3e   :  { %982 = vmatpush.bf16.msrb.mxu2 %v2121_v61  ;;  %v2016_v53 = vld [vmem:[#allocation5 + $0x290] sm:$0xf]  ;;  %v2545_v54 = vld [vmem:[#allocation5 + $0x294] sm:$0xf0]  ;;  %v2153_v55 = vor.u32 %v2579_v47, %v2152_v46  ;;  %v1944_v61 = vld [vmem:[#allocation5 + $0x200] sm:$0xf]  ;;  %v1953_v63 = vor.u32 %v2529_v52, %v1952_v49 }
  0x3f   :  { %996 = vmatpush.bf16.msrb.mxu3 %v2185_v2  ;;  %v2080_v56 = vld [vmem:[#allocation5 + $0x310] sm:$0xf]  ;;  %v2561_v57 = vld [vmem:[#allocation5 + $0x314] sm:$0xf0]  ;;  %v2527_v62 = vld [vmem:[#allocation5 + $0x204] sm:$0xf0]  ;;  %v2017_v5 = vor.u32 %v2545_v54, %v2016_v53 }
  0x40   :  { %955 = vmatpush.bf16.msrb.mxu0 %v1985_v9  ;;  %v2144_v59 = vld [vmem:[#allocation5 + $0x390] sm:$0xf]  ;;  %v2577_v60 = vld [vmem:[#allocation5 + $0x394] sm:$0xf0]  ;;  %v2008_v0 = vld [vmem:[#allocation5 + $0x280] sm:$0xf]  ;;  %v2081_v6 = vor.u32 %v2561_v57, %v2080_v56  ;;  %v1945_v19 = vor.u32 %v2527_v62, %v1944_v61 }
  0x41   :  { %969 = vmatpush.bf16.msrb.mxu1 %v2049_v12  ;;  %v2543_v2 = vld [vmem:[#allocation5 + $0x284] sm:$0xf0]  ;;  %v2072_v3 = vld [vmem:[#allocation5 + $0x300] sm:$0xf]  ;;  %v2476_v9 = vld [vmem:[#allocation5 + $0x74] sm:$0xf]  ;;  %v2145_v11 = vor.u32 %v2577_v60, %v2144_v59 }
  0x42   :  { %983 = vmatpush.bf16.msrb.mxu2 %v2113_v13  ;;  %v2559_v4 = vld [vmem:[#allocation5 + $0x304] sm:$0xf0]  ;;  %v2136_v7 = vld [vmem:[#allocation5 + $0x380] sm:$0xf]  ;;  %v1746_v12 = vld [vmem:[#allocation5 + $0x78] sm:$0xf0]  ;;  %v2009_v23 = vor.u32 %v2543_v2, %v2008_v0 }
  0x43   :  { %997 = vmatpush.bf16.msrb.mxu3 %v2177_v18  ;;  %v2575_v8 = vld [vmem:[#allocation5 + $0x384] sm:$0xf0]  ;;  %v2492_v13 = vld [vmem:[#allocation5 + $0xf4] sm:$0xf]  ;;  %v1810_v14 = vld [vmem:[#allocation5 + $0xf8] sm:$0xf0]  ;;  %v1749_v29 = vor.u32 %v2476_v9, %v1746_v12 }
  0x44   :  { %956 = vmatpush.bf16.msrb.mxu0 %v1977_v24  ;;  %v2508_v15 = vld [vmem:[#allocation5 + $0x174] sm:$0xf]  ;;  %v1874_v16 = vld [vmem:[#allocation5 + $0x178] sm:$0xf0]  ;;  %v1672_v21 = vld [vmem:[#allocation2 + $0x10] sm:$0xf]  ;;  %v2073_v24 = vor.u32 %v2559_v4, %v2072_v3  ;;  %v2137_v28 = vor.u32 %v2575_v8, %v2136_v7  ;;  %v1813_v33 = vor.u32 %v2492_v13, %v1810_v14 }
  0x45   :  { %970 = vmatpush.bf16.msrb.mxu1 %v2041_v25  ;;  %v2524_v18 = vld [vmem:[#allocation5 + $0x1f4] sm:$0xf]  ;;  %v1938_v20 = vld [vmem:[#allocation5 + $0x1f8] sm:$0xf0]  ;;  %v2460_v22 = vld [vmem:[#allocation2 + $0x2c] sm:$0xf0]  ;;  %v1877_v34 = vor.u32 %v2508_v15, %v1874_v16 }
  0x46   :  { %984 = vmatpush.bf16.msrb.mxu2 %v2105_v26  ;;  %v1680_v25 = vld [vmem:[#allocation2 + $0x18] sm:$0xf]  ;;  %v2456_v27 = vld [vmem:[#allocation2 + $0x14] sm:$0xf]  ;;  %v2457_v31 = vld [vmem:[#allocation2 + $0x1c] sm:$0xf]  ;;  %v2853_v39 = vor.u32 %v2460_v22, %v1672_v21 }
  0x47   :  { %998 = vmatpush.bf16.msrb.mxu3 %v2169_v30  ;;  %v2461_v26 = vld [vmem:[#allocation2 + $0x34] sm:$0xf0]  ;;  %v1674_v30 = vld [vmem:[#allocation2 + $0x30] sm:$0xf0]  ;;  %v1682_v32 = vld [vmem:[#allocation2 + $0x38] sm:$0xf0] }
  0x48   :  { %957 = vmatpush.bf16.msrb.mxu0 %v1969_v36  ;;  %v2474_v35 = vld [vmem:[#allocation5 + $0x64] sm:$0xf]  ;;  %v1738_v36 = vld [vmem:[#allocation5 + $0x68] sm:$0xf0]  ;;  %v2855_v43 = vor.u32 %v2461_v26, %v1680_v25  ;;  %v2857_v44 = vor.u32 %v2456_v27, %v1674_v30  ;;  %v2859_v47 = vor.u32 %v2457_v31, %v1682_v32  ;;  %v1730_v52 = vld [vmem:[#allocation5 + $0x58] sm:$0xf0] }
  0x49   :  { %971 = vmatpush.bf16.msrb.mxu1 %v2033_v37  ;;  %v2490_v37 = vld [vmem:[#allocation5 + $0xe4] sm:$0xf]  ;;  %v1802_v40 = vld [vmem:[#allocation5 + $0xe8] sm:$0xf0]  ;;  %v2488_v53 = vld [vmem:[#allocation5 + $0xd4] sm:$0xf] }
  0x4a   :  { %985 = vmatpush.bf16.msrb.mxu2 %v2097_v38  ;;  %v1941_v38 = vor.u32 %v2524_v18, %v1938_v20  ;;  %v2506_v41 = vld [vmem:[#allocation5 + $0x164] sm:$0xf]  ;;  %v1930_v46 = vld [vmem:[#allocation5 + $0x1e8] sm:$0xf0]  ;;  %v1805_v49 = vor.u32 %v2490_v37, %v1802_v40  ;;  %v2504_v56 = vld [vmem:[#allocation5 + $0x154] sm:$0xf] }
  0x4b   :  { %999 = vmatpush.bf16.msrb.mxu3 %v2161_v42  ;;  %v1866_v42 = vld [vmem:[#allocation5 + $0x168] sm:$0xf0]  ;;  %v2522_v45 = vld [vmem:[#allocation5 + $0x1e4] sm:$0xf]  ;;  %v1858_v57 = vld [vmem:[#allocation5 + $0x158] sm:$0xf0] }
  0x4c   :  { %958 = vmatpush.bf16.msrb.mxu0 %v1961_v48  ;;  %v1741_v48 = vor.u32 %v2474_v35, %v1738_v36  ;;  %v1933_v54 = vor.u32 %v2522_v45, %v1930_v46  ;;  %v2520_v59 = vld [vmem:[#allocation5 + $0x1d4] sm:$0xf]  ;;  %v1922_v60 = vld [vmem:[#allocation5 + $0x1d8] sm:$0xf0]  ;;  %v2470_v0 = vld [vmem:[#allocation5 + $0x44] sm:$0xf] }
  0x4d   :  { %972 = vmatpush.bf16.msrb.mxu1 %v2025_v50  ;;  %v1869_v50 = vor.u32 %v2506_v41, %v1866_v42  ;;  %v1722_v2 = vld [vmem:[#allocation5 + $0x48] sm:$0xf0]  ;;  %v2486_v3 = vld [vmem:[#allocation5 + $0xc4] sm:$0xf]  ;;  %v1925_v4 = vor.u32 %v2520_v59, %v1922_v60  ;;  %v2468_v14 = vld [vmem:[#allocation5 + $0x34] sm:$0xf] }
  0x4e   :  { %986 = vmatpush.bf16.msrb.mxu2 %v2089_v51  ;;  %v2472_v51 = vld [vmem:[#allocation5 + $0x54] sm:$0xf]  ;;  %v1850_v7 = vld [vmem:[#allocation5 + $0x148] sm:$0xf0]  ;;  %v2518_v8 = vld [vmem:[#allocation5 + $0x1c4] sm:$0xf] }
  0x4f   :  { %1000 = vmatpush.bf16.msrb.mxu3 %v2153_v55  ;;  %v1794_v55 = vld [vmem:[#allocation5 + $0xd8] sm:$0xf0]  ;;  %v1733_v61 = vor.u32 %v2472_v51, %v1730_v52  ;;  %v1914_v9 = vld [vmem:[#allocation5 + $0x1c8] sm:$0xf0]  ;;  %v2484_v16 = vld [vmem:[#allocation5 + $0xb4] sm:$0xf] }
  0x50   :  { %959 = vmatpush.bf16.msrb.mxu0 %v1953_v63  ;;  %v1797_v62 = vor.u32 %v2488_v53, %v1794_v55  ;;  %v1861_v63 = vor.u32 %v2504_v56, %v1858_v57  ;;  %v1714_v15 = vld [vmem:[#allocation5 + $0x38] sm:$0xf0]  ;;  %v1917_v18 = vor.u32 %v2518_v8, %v1914_v9  ;;  %v2500_v20 = vld [vmem:[#allocation5 + $0x134] sm:$0xf]  ;;  %v2466_v27 = vld [vmem:[#allocation5 + $0x24] sm:$0xf] }
  0x51   :  { %973 = vmatpush.bf16.msrb.mxu1 %v2017_v5  ;;  %v1786_v5 = vld [vmem:[#allocation5 + $0xc8] sm:$0xf0]  ;;  %v1842_v21 = vld [vmem:[#allocation5 + $0x138] sm:$0xf0]  ;;  %v2516_v22 = vld [vmem:[#allocation5 + $0x1b4] sm:$0xf] }
  0x52   :  { %987 = vmatpush.bf16.msrb.mxu2 %v2081_v6  ;;  %v2502_v6 = vld [vmem:[#allocation5 + $0x144] sm:$0xf]  ;;  %v1789_v12 = vor.u32 %v2486_v3, %v1786_v5  ;;  %v1845_v26 = vor.u32 %v2500_v20, %v1842_v21  ;;  %v1770_v31 = vld [vmem:[#allocation5 + $0xa8] sm:$0xf0]  ;;  %v2464_v40 = vld [vmem:[#allocation5 + $0x14] sm:$0xf] }
  0x53   :  { %1001 = vmatpush.bf16.msrb.mxu3 %v2145_v11  ;;  %v1725_v11 = vor.u32 %v2470_v0, %v1722_v2  ;;  %v1853_v13 = vor.u32 %v2502_v6, %v1850_v7  ;;  %v2498_v32 = vld [vmem:[#allocation5 + $0x124] sm:$0xf]  ;;  %v1898_v35 = vld [vmem:[#allocation5 + $0x1a8] sm:$0xf0]  ;;  %v1698_v41 = vld [vmem:[#allocation5 + $0x18] sm:$0xf0] }
  0x54   :  { %960 = vmatpush.bf16.msrb.mxu0 %v1945_v19  ;;  %v1778_v19 = vld [vmem:[#allocation5 + $0xb8] sm:$0xf0]  ;;  %v2480_v42 = vld [vmem:[#allocation5 + $0x94] sm:$0xf]  ;;  %v1701_v52 = vor.u32 %v2464_v40, %v1698_v41  ;;  %v2462_v53 = vld [vmem:[#allocation5 + $0x4] sm:$0xf] }
  0x55   :  { %974 = vmatpush.bf16.msrb.mxu1 %v2009_v23  ;;  %v1906_v23 = vld [vmem:[#allocation5 + $0x1b8] sm:$0xf0]  ;;  %v1781_v25 = vor.u32 %v2484_v16, %v1778_v19  ;;  %v2478_v57 = vld [vmem:[#allocation5 + $0x84] sm:$0xf]  ;;  %v1754_v59 = vld [vmem:[#allocation5 + $0x88] sm:$0xf0] }
  0x56   :  { %988 = vmatpush.bf16.msrb.mxu2 %v2073_v24  ;;  %v1717_v24 = vor.u32 %v2468_v14, %v1714_v15  ;;  %v1909_v30 = vor.u32 %v2516_v22, %v1906_v23  ;;  %v1762_v46 = vld [vmem:[#allocation5 + $0x98] sm:$0xf0]  ;;  %v2494_v60 = vld [vmem:[#allocation5 + $0x104] sm:$0xf]  ;;  %v1882_v0 = vld [vmem:[#allocation5 + $0x188] sm:$0xf0]  ;;  %v1757_v9 = vor.u32 %v2478_v57, %v1754_v59 }
  0x57   :  { %1002 = vmatpush.bf16.msrb.mxu3 %v2137_v28  ;;  %961 = vmatmul.bf16.vlgmr.msrb.gmra.mxu0 %v2853_v39  ;;  %v1706_v28 = vld [vmem:[#allocation5 + $0x28] sm:$0xf0]  ;;  %v1890_v51 = vld [vmem:[#allocation5 + $0x198] sm:$0xf0]  ;;  %v1765_v55 = vor.u32 %v2480_v42, %v1762_v46  ;;  %v2540_v2 = vld [vmem:[#allocation5 + $0x274] sm:$0xf] }
  0x58   :  { %1009 = vmatpush.bf16.msra.mxu0 %v1749_v29  ;;  %975 = vmatmul.bf16.vlgmr.msrb.gmra.mxu1 %v2857_v44  ;;  %v2482_v29 = vld [vmem:[#allocation5 + $0xa4] sm:$0xf]  ;;  %v1709_v36 = vor.u32 %v2466_v27, %v1706_v28  ;;  %v2002_v3 = vld [vmem:[#allocation5 + $0x278] sm:$0xf0]  ;;  %v2572_v7 = vld [vmem:[#allocation5 + $0x374] sm:$0xf] }
  0x59   :  { %1023 = vmatpush.bf16.msra.mxu1 %v1813_v33  ;;  %989 = vmatmul.bf16.vlgmr.msrb.gmra.mxu2 %v2855_v43  ;;  %v1834_v33 = vld [vmem:[#allocation5 + $0x128] sm:$0xf0]  ;;  %v1773_v37 = vor.u32 %v2482_v29, %v1770_v31  ;;  %v2066_v6 = vld [vmem:[#allocation5 + $0x2f8] sm:$0xf0]  ;;  %v2005_v15 = vor.u32 %v2540_v2, %v2002_v3  ;;  %v2538_v19 = vld [vmem:[#allocation5 + $0x264] sm:$0xf] }
  0x5a   :  { %1037 = vmatpush.bf16.msra.mxu2 %v1877_v34  ;;  %1003 = vmatmul.bf16.vlgmr.msrb.gmra.mxu3 %v2859_v47  ;;  %v2514_v34 = vld [vmem:[#allocation5 + $0x1a4] sm:$0xf]  ;;  %v2130_v8 = vld [vmem:[#allocation5 + $0x378] sm:$0xf0]  ;;  %v1994_v20 = vld [vmem:[#allocation5 + $0x268] sm:$0xf0] }
  0x5b   :  { %1051 = vmatpush.bf16.msra.mxu3 %v1941_v38  ;;  %v1837_v38 = vor.u32 %v2498_v32, %v1834_v33  ;;  %v1901_v45 = vor.u32 %v2514_v34, %v1898_v35  ;;  %v2554_v21 = vld [vmem:[#allocation5 + $0x2e4] sm:$0xf]  ;;  %v2058_v23 = vld [vmem:[#allocation5 + $0x2e8] sm:$0xf0]  ;;  %v1997_v28 = vor.u32 %v2538_v19, %v1994_v20  ;;  %v2536_v31 = vld [vmem:[#allocation5 + $0x254] sm:$0xf] }
  0x5c   :  { %1010 = vmatpush.bf16.msra.mxu0 %v1741_v48  ;;  %v2496_v48 = vld [vmem:[#allocation5 + $0x114] sm:$0xf]  ;;  %v2186_v27 = vld [vmem:[#allocation5 + $0x3e8] sm:$0xf0]  ;;  %v2061_v29 = vor.u32 %v2554_v21, %v2058_v23  ;;  %v1986_v32 = vld [vmem:[#allocation5 + $0x258] sm:$0xf0] }
  0x5d   :  { %1024 = vmatpush.bf16.msra.mxu1 %v1805_v49  ;;  %v1826_v49 = vld [vmem:[#allocation5 + $0x118] sm:$0xf0]  ;;  %v2552_v33 = vld [vmem:[#allocation5 + $0x2d4] sm:$0xf]  ;;  %v1989_v41 = vor.u32 %v2536_v31, %v1986_v32  ;;  %v2534_v46 = vld [vmem:[#allocation5 + $0x244] sm:$0xf] }
  0x5e   :  { %1038 = vmatpush.bf16.msra.mxu2 %v1869_v50  ;;  %v2512_v50 = vld [vmem:[#allocation5 + $0x194] sm:$0xf]  ;;  %v1829_v56 = vor.u32 %v2496_v48, %v1826_v49  ;;  %v2050_v35 = vld [vmem:[#allocation5 + $0x2d8] sm:$0xf0]  ;;  %v1978_v48 = vld [vmem:[#allocation5 + $0x248] sm:$0xf0] }
  0x5f   :  { %1052 = vmatpush.bf16.msra.mxu3 %v1933_v54  ;;  %v1690_v54 = vld [vmem:[#allocation5 + $0x8] sm:$0xf0]  ;;  %v2178_v40 = vld [vmem:[#allocation5 + $0x3d8] sm:$0xf0]  ;;  %v2053_v42 = vor.u32 %v2552_v33, %v2050_v35  ;;  %v2548_v57 = vld [vmem:[#allocation5 + $0x2b4] sm:$0xf] }
  0x60   :  { %1011 = vmatpush.bf16.msra.mxu0 %v1733_v61  ;;  %v1893_v61 = vor.u32 %v2512_v50, %v1890_v51  ;;  %v1693_v5 = vor.u32 %v2462_v53, %v1690_v54  ;;  %v2042_v50 = vld [vmem:[#allocation5 + $0x2c8] sm:$0xf0]  ;;  %v2566_v51 = vld [vmem:[#allocation5 + $0x344] sm:$0xf]  ;;  %v2528_v19 = vld [vmem:[#allocation5 + $0x214] sm:$0xf] }
  0x61   :  { %1025 = vmatpush.bf16.msra.mxu1 %v1797_v62  ;;  %v1818_v62 = vld [vmem:[#allocation5 + $0x108] sm:$0xf0]  ;;  %v1954_v20 = vld [vmem:[#allocation5 + $0x218] sm:$0xf0]  ;;  %v2544_v21 = vld [vmem:[#allocation5 + $0x294] sm:$0xf] }
  0x62   :  { %1039 = vmatpush.bf16.msra.mxu2 %v1861_v63  ;;  %v2510_v63 = vld [vmem:[#allocation5 + $0x184] sm:$0xf]  ;;  %v2170_v53 = vld [vmem:[#allocation5 + $0x3c8] sm:$0xf0]  ;;  %v2018_v23 = vld [vmem:[#allocation5 + $0x298] sm:$0xf0] }
  0x63   :  { %1053 = vmatpush.bf16.msra.mxu3 %v1925_v4  ;;  %v2556_v4 = vld [vmem:[#allocation5 + $0x2f4] sm:$0xf]  ;;  %v1885_v14 = vor.u32 %v2510_v63, %v1882_v0  ;;  %v2162_v0 = vld [vmem:[#allocation5 + $0x3b8] sm:$0xf0]  ;;  %v2526_v31 = vld [vmem:[#allocation5 + $0x204] sm:$0xf] }
  0x64   :  { %1012 = vmatpush.bf16.msra.mxu0 %v1725_v11  ;;  %v1821_v11 = vor.u32 %v2494_v60, %v1818_v62  ;;  %v2069_v16 = vor.u32 %v2556_v4, %v2066_v6  ;;  %v2034_v60 = vld [vmem:[#allocation5 + $0x2b8] sm:$0xf0]  ;;  %v2580_v63 = vld [vmem:[#allocation5 + $0x3b4] sm:$0xf]  ;;  %v1962_v6 = vld [vmem:[#allocation5 + $0x228] sm:$0xf0] }
  0x65   :  { %1026 = vmatpush.bf16.msra.mxu1 %v1789_v12  ;;  %v2588_v12 = vld [vmem:[#allocation5 + $0x3f4] sm:$0xf]  ;;  %v2098_v62 = vld [vmem:[#allocation5 + $0x338] sm:$0xf0]  ;;  %v2037_v3 = vor.u32 %v2548_v57, %v2034_v60  ;;  %v1946_v32 = vld [vmem:[#allocation5 + $0x208] sm:$0xf0] }
  0x66   :  { %1040 = vmatpush.bf16.msra.mxu2 %v1853_v13  ;;  %v2194_v13 = vld [vmem:[#allocation5 + $0x3f8] sm:$0xf0]  ;;  %v2542_v33 = vld [vmem:[#allocation5 + $0x284] sm:$0xf]  ;;  %v2010_v35 = vld [vmem:[#allocation5 + $0x288] sm:$0xf0] }
  0x67   :  { %1054 = vmatpush.bf16.msra.mxu3 %v1917_v18  ;;  %v2133_v18 = vor.u32 %v2572_v7, %v2130_v8  ;;  %v2197_v22 = vor.u32 %v2588_v12, %v2194_v13  ;;  %v2546_v7 = vld [vmem:[#allocation5 + $0x2a4] sm:$0xf]  ;;  %v2165_v8 = vor.u32 %v2580_v63, %v2162_v0  ;;  %v2090_v12 = vld [vmem:[#allocation5 + $0x328] sm:$0xf0]  ;;  %v2599_v60 = vld [vmem:[#allocation7 + $0x44] sm:$0xf0] }
  0x68   :  { %1013 = vmatpush.bf16.msra.mxu0 %v1717_v24  ;;  %v2570_v24 = vld [vmem:[#allocation5 + $0x364] sm:$0xf]  ;;  %v2234_v63 = vld [vmem:[#allocation7 + $0x48] sm:$0xf0] }
  0x69   :  { %1027 = vmatpush.bf16.msra.mxu1 %v1781_v25  ;;  %v2122_v25 = vld [vmem:[#allocation5 + $0x368] sm:$0xf0]  ;;  %v2578_v13 = vld [vmem:[#allocation5 + $0x3a4] sm:$0xf] }
  0x6a   :  { %1041 = vmatpush.bf16.msra.mxu2 %v1845_v26  ;;  %v2586_v26 = vld [vmem:[#allocation5 + $0x3e4] sm:$0xf] }
  0x6b   :  { %1055 = vmatpush.bf16.msra.mxu3 %v1909_v30  ;;  %v2125_v30 = vor.u32 %v2570_v24, %v2122_v25  ;;  %v2189_v34 = vor.u32 %v2586_v26, %v2186_v27  ;;  %v2560_v24 = vld [vmem:[#allocation5 + $0x314] sm:$0xf]  ;;  %v2082_v25 = vld [vmem:[#allocation5 + $0x318] sm:$0xf0] }
  0x6c   :  { %1014 = vmatpush.bf16.msra.mxu0 %v1709_v36  ;;  %v2568_v36 = vld [vmem:[#allocation5 + $0x354] sm:$0xf]  ;;  %v2146_v27 = vld [vmem:[#allocation5 + $0x398] sm:$0xf0] }
  0x6d   :  { %1028 = vmatpush.bf16.msra.mxu1 %v1773_v37  ;;  %v2114_v37 = vld [vmem:[#allocation5 + $0x358] sm:$0xf0]  ;;  %v2576_v26 = vld [vmem:[#allocation5 + $0x394] sm:$0xf] }
  0x6e   :  { %1042 = vmatpush.bf16.msra.mxu2 %v1837_v38  ;;  %v2584_v38 = vld [vmem:[#allocation5 + $0x3d4] sm:$0xf] }
  0x6f   :  { %1056 = vmatpush.bf16.msra.mxu3 %v1901_v45  ;;  %v2117_v45 = vor.u32 %v2568_v36, %v2114_v37  ;;  %v2181_v49 = vor.u32 %v2584_v38, %v2178_v40  ;;  %v2558_v36 = vld [vmem:[#allocation5 + $0x304] sm:$0xf]  ;;  %v2074_v37 = vld [vmem:[#allocation5 + $0x308] sm:$0xf0] }
  0x70   :  { %1015 = vmatpush.bf16.msra.mxu0 %v1701_v52  ;;  %v2582_v52 = vld [vmem:[#allocation5 + $0x3c4] sm:$0xf]  ;;  %v2138_v40 = vld [vmem:[#allocation5 + $0x388] sm:$0xf0] }
  0x71   :  { %1029 = vmatpush.bf16.msra.mxu1 %v1765_v55  ;;  %v2532_v55 = vld [vmem:[#allocation5 + $0x234] sm:$0xf]  ;;  %v2173_v59 = vor.u32 %v2582_v52, %v2170_v53  ;;  %v2574_v38 = vld [vmem:[#allocation5 + $0x384] sm:$0xf]  ;;  %v2603_v52 = vld [vmem:[#allocation7 + $0x64] sm:$0xf0] }
  0x72   :  { %1043 = vmatpush.bf16.msra.mxu2 %v1829_v56  ;;  %v1970_v56 = vld [vmem:[#allocation5 + $0x238] sm:$0xf0] }
  0x73   :  { %1057 = vmatpush.bf16.msra.mxu3 %v1893_v61  ;;  %v2564_v61 = vld [vmem:[#allocation5 + $0x334] sm:$0xf]  ;;  %v1973_v2 = vor.u32 %v2532_v55, %v1970_v56  ;;  %v2242_v56 = vld [vmem:[#allocation7 + $0x58] sm:$0xf0] }
  0x74   :  { %1016 = vmatpush.bf16.msra.mxu0 %v1693_v5  ;;  %v2101_v4 = vor.u32 %v2564_v61, %v2098_v62  ;;  %v2530_v5 = vld [vmem:[#allocation5 + $0x224] sm:$0xf]  ;;  %v2600_v55 = vld [vmem:[#allocation7 + $0x54] sm:$0xf] }
  0x75   :  { %1030 = vmatpush.bf16.msra.mxu1 %v1757_v9  ;;  %v2026_v9 = vld [vmem:[#allocation5 + $0x2a8] sm:$0xf0]  ;;  %v2245_v57 = vor.u32 %v2600_v55, %v2242_v56  ;;  %v2598_v61 = vld [vmem:[#allocation7 + $0x44] sm:$0xf] }
  0x76   :  { %1044 = vmatpush.bf16.msra.mxu2 %v1821_v11  ;;  %v2562_v11 = vld [vmem:[#allocation5 + $0x324] sm:$0xf]  ;;  %v2237_v0 = vor.u32 %v2598_v61, %v2234_v63  ;;  %v2314_v63 = vld [vmem:[#allocation7 + $0xe8] sm:$0xf0] }
  0x77   :  { %1058 = vmatpush.bf16.msra.mxu3 %v1885_v14  ;;  %1017 = vmatmul.bf16.vlgmr.msra.gmra.mxu0 %v2841_v58  ;;  %v1981_v58 = vor.u32 %v2534_v46, %v1978_v48  ;;  %v2154_v14 = vld [vmem:[#allocation5 + $0x3a8] sm:$0xf0]  ;;  %v2141_v46 = vor.u32 %v2574_v38, %v2138_v40  ;;  %v2256_v48 = vld [vmem:[#allocation7 + $0x70] sm:$0xf] }
  0x78   :  { %1065 = vmatpush.bf16.msrb.mxu0 %v2005_v15  ;;  %1031 = vmatmul.bf16.vlgmr.msra.gmra.mxu1 %v2847_v10  ;;  %v1965_v15 = vor.u32 %v2530_v5, %v1962_v6  ;;  %v2226_v6 = vld [vmem:[#allocation7 + $0x38] sm:$0xf0] }
  0x79   :  { %1079 = vmatpush.bf16.msrb.mxu1 %v2069_v16  ;;  %1045 = vmatmul.bf16.vlgmr.msra.gmra.mxu2 %v2843_v1  ;;  %v2550_v1 = vld [vmem:[#allocation5 + $0x2c4] sm:$0xf]  ;;  %v2029_v16 = vor.u32 %v2546_v7, %v2026_v9  ;;  %v2216_v9 = vld [vmem:[#allocation7 + $0x20] sm:$0xf] }
  0x7a   :  { %1093 = vmatpush.bf16.msrb.mxu2 %v2133_v18  ;;  %1059 = vmatmul.bf16.vlgmr.msra.gmra.mxu3 %v2849_v17  ;;  %v2106_v17 = vld [vmem:[#allocation5 + $0x348] sm:$0xf0]  ;;  %v2045_v54 = vor.u32 %v2550_v1, %v2042_v50  ;;  %v2093_v18 = vor.u32 %v2562_v11, %v2090_v12  ;;  %v2605_v1 = vld [vmem:[#allocation7 + $0x74] sm:$0xf0]  ;;  %v2595_v11 = vld [vmem:[#allocation7 + $0x24] sm:$0xf0] }
  0x7b   :  { %1107 = vmatpush.bf16.msrb.mxu3 %v2197_v22  ;;  %v2109_v10 = vor.u32 %v2566_v51, %v2106_v17  ;;  %v2157_v22 = vor.u32 %v2578_v13, %v2154_v14  ;;  %v2257_v50 = vor.u32 %v2605_v1, %v2256_v48  ;;  %v2258_v51 = vld [vmem:[#allocation7 + $0x78] sm:$0xf0]  ;;  %v2248_v17 = vld [vmem:[#allocation7 + $0x60] sm:$0xf]  ;;  %v2594_v12 = vld [vmem:[#allocation7 + $0x24] sm:$0xf]  ;;  %v2217_v14 = vor.u32 %v2595_v11, %v2216_v9 }
  0x7c   :  { %1066 = vmatpush.bf16.msrb.mxu0 %v1997_v28  ;;  %v1957_v28 = vor.u32 %v2528_v19, %v1954_v20  ;;  %v2593_v19 = vld [vmem:[#allocation7 + $0x14] sm:$0xf0]  ;;  %v2592_v20 = vld [vmem:[#allocation7 + $0x14] sm:$0xf] }
  0x7d   :  { %1080 = vmatpush.bf16.msrb.mxu1 %v2061_v29  ;;  %v2021_v29 = vor.u32 %v2544_v21, %v2018_v23  ;;  %v2616_v9 = vld [vmem:[#allocation7 + $0xd4] sm:$0xf] }
  0x7e   :  { %1094 = vmatpush.bf16.msrb.mxu2 %v2125_v30  ;;  %v2085_v30 = vor.u32 %v2560_v24, %v2082_v25 }
  0x7f   :  { %1108 = vmatpush.bf16.msrb.mxu3 %v2189_v34  ;;  %v2149_v34 = vor.u32 %v2576_v26, %v2146_v27  ;;  %v2200_v26 = vld [vmem:[#allocation7] sm:$0xf]  ;;  %v2591_v27 = vld [vmem:[#allocation7 + $0x4] sm:$0xf0] }
  0x80   :  { %1067 = vmatpush.bf16.msrb.mxu0 %v1989_v41  ;;  %v1949_v41 = vor.u32 %v2526_v31, %v1946_v32 }
  0x81   :  { %1081 = vmatpush.bf16.msrb.mxu1 %v2053_v42  ;;  %v2013_v42 = vor.u32 %v2542_v33, %v2010_v35 }
  0x82   :  { %1095 = vmatpush.bf16.msrb.mxu2 %v2117_v45  ;;  %v2077_v45 = vor.u32 %v2558_v36, %v2074_v37 }
  0x83   :  { %1109 = vmatpush.bf16.msrb.mxu3 %v2181_v49  ;;  %v2604_v49 = vld [vmem:[#allocation7 + $0x74] sm:$0xf] }
  0x84   :  { %1068 = vmatpush.bf16.msrb.mxu0 %v1981_v58  ;;  %v2261_v53 = vor.u32 %v2604_v49, %v2258_v51  ;;  %v2602_v58 = vld [vmem:[#allocation7 + $0x64] sm:$0xf] }
  0x85   :  { %1082 = vmatpush.bf16.msrb.mxu1 %v2045_v54  ;;  %v2250_v54 = vld [vmem:[#allocation7 + $0x68] sm:$0xf0] }
  0x86   :  { %1096 = vmatpush.bf16.msrb.mxu2 %v2109_v10  ;;  %v2249_v10 = vor.u32 %v2603_v52, %v2248_v17 }
  0x87   :  { %1110 = vmatpush.bf16.msrb.mxu3 %v2173_v59  ;;  %v2232_v59 = vld [vmem:[#allocation7 + $0x40] sm:$0xf] }
  0x88   :  { %1069 = vmatpush.bf16.msrb.mxu0 %v1973_v2  ;;  %v2233_v62 = vor.u32 %v2599_v60, %v2232_v59  ;;  %v2224_v2 = vld [vmem:[#allocation7 + $0x30] sm:$0xf]  ;;  %v2312_v59 = vld [vmem:[#allocation7 + $0xe0] sm:$0xf]  ;;  %v2619_v60 = vld [vmem:[#allocation7 + $0xe4] sm:$0xf0] }
  0x89   :  { %1083 = vmatpush.bf16.msrb.mxu1 %v2037_v3  ;;  %v2597_v3 = vld [vmem:[#allocation7 + $0x34] sm:$0xf0] }
  0x8a   :  { %1097 = vmatpush.bf16.msrb.mxu2 %v2101_v4  ;;  %v2596_v4 = vld [vmem:[#allocation7 + $0x34] sm:$0xf]  ;;  %v2225_v5 = vor.u32 %v2597_v3, %v2224_v2  ;;  %v2313_v2 = vor.u32 %v2619_v60, %v2312_v59 }
  0x8b   :  { %1111 = vmatpush.bf16.msrb.mxu3 %v2165_v8  ;;  %v2229_v7 = vor.u32 %v2596_v4, %v2226_v6 }
  0x8c   :  { %1070 = vmatpush.bf16.msrb.mxu0 %v1965_v15  ;;  %v2218_v15 = vld [vmem:[#allocation7 + $0x28] sm:$0xf0] }
  0x8d   :  { %1084 = vmatpush.bf16.msrb.mxu1 %v2029_v16  ;;  %v2221_v16 = vor.u32 %v2594_v12, %v2218_v15  ;;  %v2306_v12 = vld [vmem:[#allocation7 + $0xd8] sm:$0xf0]  ;;  %v2615_v15 = vld [vmem:[#allocation7 + $0xc4] sm:$0xf0] }
  0x8e   :  { %1098 = vmatpush.bf16.msrb.mxu2 %v2093_v18  ;;  %v2208_v18 = vld [vmem:[#allocation7 + $0x10] sm:$0xf] }
  0x8f   :  { %1112 = vmatpush.bf16.msrb.mxu3 %v2157_v22  ;;  %v2209_v21 = vor.u32 %v2593_v19, %v2208_v18  ;;  %v2210_v22 = vld [vmem:[#allocation7 + $0x18] sm:$0xf0]  ;;  %v2298_v19 = vld [vmem:[#allocation7 + $0xc8] sm:$0xf0] }
  0x90   :  { %1071 = vmatpush.bf16.msrb.mxu0 %v1957_v28  ;;  %v2213_v23 = vor.u32 %v2592_v20, %v2210_v22  ;;  %v2590_v28 = vld [vmem:[#allocation7 + $0x4] sm:$0xf]  ;;  %v2613_v22 = vld [vmem:[#allocation7 + $0xb4] sm:$0xf0] }
  0x91   :  { %1085 = vmatpush.bf16.msrb.mxu1 %v2021_v29  ;;  %v2201_v29 = vor.u32 %v2591_v27, %v2200_v26  ;;  %v2280_v27 = vld [vmem:[#allocation7 + $0xa0] sm:$0xf] }
  0x92   :  { %1099 = vmatpush.bf16.msrb.mxu2 %v2085_v30  ;;  %v2202_v30 = vld [vmem:[#allocation7 + $0x8] sm:$0xf0] }
  0x93   :  { %1113 = vmatpush.bf16.msrb.mxu3 %v2149_v34  ;;  %v2205_v32 = vor.u32 %v2590_v28, %v2202_v30  ;;  %v2611_v28 = vld [vmem:[#allocation7 + $0xa4] sm:$0xf0] }
  0x94   :  { %1072 = vmatpush.bf16.msrb.mxu0 %v1949_v41  ;;  %v2281_v30 = vor.u32 %v2611_v28, %v2280_v27  ;;  %v2652_v27 = vld [vmem:[#allocation8 + $0xf4] sm:$0xf]  ;;  %v2450_v28 = vld [vmem:[#allocation8 + $0xf8] sm:$0xf0] }
  0x95   :  { %1086 = vmatpush.bf16.msrb.mxu1 %v2013_v42 }
  0x96   :  { %1100 = vmatpush.bf16.msrb.mxu2 %v2077_v45 }
  0x97   :  { %1114 = vmatpush.bf16.msrb.mxu3 %v2141_v46  ;;  %1073 = vmatmul.bf16.vlgmr.msrb.gmra.mxu0 %v2853_v39  ;;  %v2253_v39 = vor.u32 %v2602_v58, %v2250_v54 }
  0x98   :  { %1087 = vmatmul.bf16.vlgmr.msrb.gmra.mxu1 %v2857_v44  ;;  %1319 = vmatpush.bf16.msra.mxu0 %v2257_v50  ;;  %v2240_v44 = vld [vmem:[#allocation7 + $0x50] sm:$0xf] }
  0x99   :  { %1101 = vmatmul.bf16.vlgmr.msrb.gmra.mxu2 %v2855_v43  ;;  %v2601_v43 = vld [vmem:[#allocation7 + $0x54] sm:$0xf0] }
  0x9a   :  { %1115 = vmatmul.bf16.vlgmr.msrb.gmra.mxu3 %v2859_v47  ;;  %1347 = vmatpush.bf16.msra.mxu2 %v2261_v53  ;;  %v2241_v47 = vor.u32 %v2601_v43, %v2240_v44  ;;  %v2620_v44 = vld [vmem:[#allocation7 + $0xf4] sm:$0xf] }
  0x9c   :  { %1320 = vmatpush.bf16.msra.mxu0 %v2249_v10  ;;  %v2320_v10 = vld [vmem:[#allocation7 + $0xf0] sm:$0xf] }
  0x9e   :  { %1348 = vmatpush.bf16.msra.mxu2 %v2253_v39  ;;  %v2621_v39 = vld [vmem:[#allocation7 + $0xf4] sm:$0xf0] }
  0x9f   :  { %v2321_v56 = vor.u32 %v2621_v39, %v2320_v10 }
  0xa0   :  { %1321 = vmatpush.bf16.msra.mxu0 %v2241_v47 }
  0xa1   :  { %1333 = vmatpush.bf16.msra.mxu1 %v2321_v56 }
  0xa2   :  { %1349 = vmatpush.bf16.msra.mxu2 %v2245_v57  ;;  %v2322_v57 = vld [vmem:[#allocation7 + $0xf8] sm:$0xf0] }
  0xa3   :  { %v2325_v61 = vor.u32 %v2620_v44, %v2322_v57 }
  0xa4   :  { %1322 = vmatpush.bf16.msra.mxu0 %v2233_v62  ;;  %v2618_v62 = vld [vmem:[#allocation7 + $0xe4] sm:$0xf] }
  0xa5   :  { %1361 = vmatpush.bf16.msra.mxu3 %v2325_v61  ;;  %v2317_v3 = vor.u32 %v2618_v62, %v2314_v63  ;;  %1334 = vmatpush.bf16.msra.mxu1 %v2313_v2 }
  0xa6   :  { %1350 = vmatpush.bf16.msra.mxu2 %v2237_v0 }
  0xa8   :  { %1323 = vmatpush.bf16.msra.mxu0 %v2225_v5 }
  0xa9   :  { %1362 = vmatpush.bf16.msra.mxu3 %v2317_v3 }
  0xaa   :  { %1351 = vmatpush.bf16.msra.mxu2 %v2229_v7  ;;  %v2304_v7 = vld [vmem:[#allocation7 + $0xd0] sm:$0xf] }
  0xac   :  { %1324 = vmatpush.bf16.msra.mxu0 %v2217_v14  ;;  %v2296_v14 = vld [vmem:[#allocation7 + $0xc0] sm:$0xf] }
  0xad   :  { %v2297_v18 = vor.u32 %v2615_v15, %v2296_v14  ;;  %v2637_v14 = vld [vmem:[#allocation8 + $0x74] sm:$0xf0]  ;;  %v2636_v15 = vld [vmem:[#allocation8 + $0x74] sm:$0xf] }
  0xae   :  { %1352 = vmatpush.bf16.msra.mxu2 %v2221_v16  ;;  %v2614_v16 = vld [vmem:[#allocation7 + $0xc4] sm:$0xf] }
  0xaf   :  { %v2301_v20 = vor.u32 %v2614_v16, %v2298_v19  ;;  %v2376_v19 = vld [vmem:[#allocation8 + $0x60] sm:$0xf] }
  0xb0   :  { %1325 = vmatpush.bf16.msra.mxu0 %v2209_v21  ;;  %v2288_v21 = vld [vmem:[#allocation7 + $0xb0] sm:$0xf] }
  0xb2   :  { %1353 = vmatpush.bf16.msra.mxu2 %v2213_v23  ;;  %v2612_v23 = vld [vmem:[#allocation7 + $0xb4] sm:$0xf] }
  0xb4   :  { %v906_v8 = vpop.f32.mrf.mxu0  ;;  %1326 = vmatpush.bf16.msra.mxu0 %v2201_v29  ;;  %v2610_v29 = vld [vmem:[#allocation7 + $0xa4] sm:$0xf] }
  0xb5   :  { %v920_v13 = vpop.f32.mrf.mxu1 }
  0xb6   :  { %v921_v34 = vadd.f32 %v920_v13, %v906_v8  ;;  %1354 = vmatpush.bf16.msra.mxu2 %v2205_v32  ;;  %v2617_v8 = vld [vmem:[#allocation7 + $0xd4] sm:$0xf0]  ;;  %v2309_v13 = vor.u32 %v2616_v9, %v2306_v12 }
  0xb7   :  { %v2305_v11 = vor.u32 %v2617_v8, %v2304_v7 }
  0xb8   :  { %1363 = vmatpush.bf16.msra.mxu3 %v2309_v13  ;;  %v2384_v13 = vld [vmem:[#allocation8 + $0x70] sm:$0xf] }
  0xb9   :  { %1335 = vmatpush.bf16.msra.mxu1 %v2305_v11  ;;  %v2385_v16 = vor.u32 %v2637_v14, %v2384_v13  ;;  %v2418_v13 = vld [vmem:[#allocation8 + $0xb8] sm:$0xf0] }
  0xbb   :  { %1573 = vmatpush.bf16.msrb.mxu0 %v2385_v16  ;;  %v2625_v16 = vld [vmem:[#allocation8 + $0x14] sm:$0xf0] }
  0xbc   :  { %v934_v24 = vpop.f32.mrf.mxu2  ;;  %v908_v31 = vpop.f32.mrf.mxu0  ;;  %1364 = vmatpush.bf16.msra.mxu3 %v2301_v20  ;;  %v2635_v20 = vld [vmem:[#allocation8 + $0x64] sm:$0xf0] }
  0xbd   :  { %v948_v25 = vpop.f32.mrf.mxu3  ;;  %v922_v33 = vpop.f32.mrf.mxu1  ;;  %v935_v35 = vadd.f32 %v934_v24, %v921_v34  ;;  %1336 = vmatpush.bf16.msra.mxu1 %v2297_v18  ;;  %v2289_v24 = vor.u32 %v2613_v22, %v2288_v21  ;;  %v2272_v34 = vld [vmem:[#allocation7 + $0x90] sm:$0xf]  ;;  %v2386_v18 = vld [vmem:[#allocation8 + $0x78] sm:$0xf0]  ;;  %v2634_v22 = vld [vmem:[#allocation8 + $0x64] sm:$0xf] }
  0xbe   :  { %v923_v40 = vadd.f32 %v922_v33, %v908_v31  ;;  %v2282_v31 = vld [vmem:[#allocation7 + $0xa8] sm:$0xf0]  ;;  %v2389_v21 = vor.u32 %v2636_v15, %v2386_v18  ;;  %v2336_v15 = vld [vmem:[#allocation8 + $0x10] sm:$0xf]  ;;  %v2624_v18 = vld [vmem:[#allocation8 + $0x14] sm:$0xf] }
  0xbf   :  { %v949_v38 = vadd.f32 %v948_v25, %v935_v35  ;;  %v2290_v25 = vld [vmem:[#allocation7 + $0xb8] sm:$0xf0]  ;;  %v2285_v32 = vor.u32 %v2610_v29, %v2282_v31  ;;  %v2609_v35 = vld [vmem:[#allocation7 + $0x94] sm:$0xf0]  ;;  %v2453_v31 = vor.u32 %v2652_v27, %v2450_v28  ;;  %v2328_v28 = vld [vmem:[#allocation8] sm:$0xf] }
  0xc0   :  { %v2293_v26 = vor.u32 %v2612_v23, %v2290_v25  ;;  %v2378_v23 = vld [vmem:[#allocation8 + $0x68] sm:$0xf0]  ;;  %v2377_v25 = vor.u32 %v2635_v20, %v2376_v19  ;;  %1601 = vmatpush.bf16.msrb.mxu2 %v2389_v21  ;;  %v2337_v19 = vor.u32 %v2625_v16, %v2336_v15  ;;  %v2338_v20 = vld [vmem:[#allocation8 + $0x18] sm:$0xf0] }
  0xc1   :  { %1337 = vmatpush.bf16.msra.mxu1 %v2289_v24  ;;  %v2448_v24 = vld [vmem:[#allocation8 + $0xf0] sm:$0xf]  ;;  %v2381_v29 = vor.u32 %v2634_v22, %v2378_v23  ;;  %v2341_v21 = vor.u32 %v2624_v18, %v2338_v20  ;;  %v2408_v22 = vld [vmem:[#allocation8 + $0xa0] sm:$0xf]  ;;  %v2643_v23 = vld [vmem:[#allocation8 + $0xa4] sm:$0xf0] }
  0xc2   :  { %1365 = vmatpush.bf16.msra.mxu3 %v2293_v26  ;;  %v2653_v26 = vld [vmem:[#allocation8 + $0xf4] sm:$0xf0]  ;;  %1574 = vmatpush.bf16.msrb.mxu0 %v2377_v25  ;;  %v2409_v25 = vor.u32 %v2643_v23, %v2408_v22 }
  0xc4   :  { %v936_v36 = vpop.f32.mrf.mxu2  ;;  %1602 = vmatpush.bf16.msrb.mxu2 %v2381_v29  ;;  %v2623_v29 = vld [vmem:[#allocation8 + $0x4] sm:$0xf0] }
  0xc5   :  { %v950_v37 = vpop.f32.mrf.mxu3  ;;  %v937_v45 = vadd.f32 %v936_v36, %v923_v40  ;;  %1338 = vmatpush.bf16.msra.mxu1 %v2281_v30  ;;  %v2608_v36 = vld [vmem:[#allocation7 + $0x94] sm:$0xf]  ;;  %v2449_v30 = vor.u32 %v2653_v26, %v2448_v24  ;;  %v2642_v24 = vld [vmem:[#allocation8 + $0xa4] sm:$0xf]  ;;  %v2410_v26 = vld [vmem:[#allocation8 + $0xa8] sm:$0xf0] }
  0xc6   :  { %1366 = vmatpush.bf16.msra.mxu3 %v2285_v32  ;;  %v2368_v32 = vld [vmem:[#allocation8 + $0x50] sm:$0xf]  ;;  %v2413_v27 = vor.u32 %v2642_v24, %v2410_v26 }
  0xc7   :  { %v951_v1 = vadd.f32 %v950_v37, %v937_v45  ;;  %v2273_v37 = vor.u32 %v2609_v35, %v2272_v34  ;;  %v2607_v45 = vld [vmem:[#allocation7 + $0x84] sm:$0xf0]  ;;  %v2632_v34 = vld [vmem:[#allocation8 + $0x54] sm:$0xf]  ;;  %v2370_v35 = vld [vmem:[#allocation8 + $0x58] sm:$0xf0] }
  0xc9   :  { %1339 = vmatpush.bf16.msra.mxu1 %v2273_v37  ;;  %v2651_v37 = vld [vmem:[#allocation8 + $0xe4] sm:$0xf0] }
  0xd4   :  { %v962_v41 = vpop.f32.mrf.mxu0 }
  0xd5   :  { %v976_v42 = vpop.f32.mrf.mxu1  ;;  %v963_v46 = vadd.f32 %v962_v41, %v949_v38  ;;  %v2274_v38 = vld [vmem:[#allocation7 + $0x98] sm:$0xf0] }
  0xd6   :  { %v2277_v41 = vor.u32 %v2608_v36, %v2274_v38  ;;  %v2440_v36 = vld [vmem:[#allocation8 + $0xe0] sm:$0xf] }
  0xd7   :  { %v977_v49 = vadd.f32 %v976_v42, %v963_v46  ;;  %v2264_v42 = vld [vmem:[#allocation7 + $0x80] sm:$0xf]  ;;  %v2606_v46 = vld [vmem:[#allocation7 + $0x84] sm:$0xf]  ;;  %v2441_v38 = vor.u32 %v2651_v37, %v2440_v36  ;;  %v2640_v36 = vld [vmem:[#allocation8 + $0x94] sm:$0xf] }
  0xd8   :  { %1367 = vmatpush.bf16.msra.mxu3 %v2277_v41  ;;  %v2442_v41 = vld [vmem:[#allocation8 + $0xe8] sm:$0xf0] }
  0xdc   :  { %v990_v48 = vpop.f32.mrf.mxu2  ;;  %v964_v50 = vpop.f32.mrf.mxu0 }
  0xdd   :  { %v1004_v51 = vpop.f32.mrf.mxu3  ;;  %v965_v17 = vadd.f32 %v964_v50, %v951_v1  ;;  %v978_v52 = vpop.f32.mrf.mxu1  ;;  %v991_v53 = vadd.f32 %v990_v48, %v977_v49  ;;  %v2265_v48 = vor.u32 %v2607_v45, %v2264_v42  ;;  %v2266_v1 = vld [vmem:[#allocation7 + $0x88] sm:$0xf0] }
  0xde   :  { %v2269_v50 = vor.u32 %v2606_v46, %v2266_v1  ;;  %v2360_v46 = vld [vmem:[#allocation8 + $0x40] sm:$0xf]  ;;  %v2373_v1 = vor.u32 %v2632_v34, %v2370_v35  ;;  %v2400_v34 = vld [vmem:[#allocation8 + $0x90] sm:$0xf]  ;;  %v2641_v35 = vld [vmem:[#allocation8 + $0x94] sm:$0xf0] }
  0xdf   :  { %v979_v58 = vadd.f32 %v978_v52, %v965_v17  ;;  %v1005_v43 = vadd.f32 %v1004_v51, %v991_v53  ;;  %1340 = vmatpush.bf16.msra.mxu1 %v2265_v48  ;;  %v2631_v48 = vld [vmem:[#allocation8 + $0x44] sm:$0xf0]  ;;  %v2401_v37 = vor.u32 %v2641_v35, %v2400_v34 }
  0xe0   :  { %1368 = vmatpush.bf16.msra.mxu3 %v2269_v50  ;;  %v2649_v50 = vld [vmem:[#allocation8 + $0xd4] sm:$0xf0]  ;;  %1603 = vmatpush.bf16.msrb.mxu2 %v2373_v1 }
  0xe1   :  { %v1121_v4 = vmax.f32 %v1005_v43, 0.0 }
  0xe3   :  { %1587 = vmatpush.bf16.msrb.mxu1 %v2449_v30  ;;  %v2622_v30 = vld [vmem:[#allocation8 + $0x4] sm:$0xf] }
  0xe4   :  { %v992_v54 = vpop.f32.mrf.mxu2  ;;  %1615 = vmatpush.bf16.msrb.mxu3 %v2453_v31  ;;  %v2329_v31 = vor.u32 %v2623_v29, %v2328_v28 }
  0xe5   :  { %v993_v55 = vadd.f32 %v992_v54, %v979_v58  ;;  %v1006_v47 = vpop.f32.mrf.mxu3 }
  0xe7   :  { %v1007_v0 = vadd.f32 %v1006_v47, %v993_v55  ;;  %1588 = vmatpush.bf16.msrb.mxu1 %v2441_v38  ;;  %v2402_v38 = vld [vmem:[#allocation8 + $0x98] sm:$0xf0] }
  0xe9   :  { %v1123_v5 = vmax.f32 %v1007_v0, 0.0 }
  0xeb   :  { %v1125_v6 = vpack.c.bf16 %v1123_v5, %v1121_v4 }
  0xed   :  { %1327 = vmatmul.bf16.vlgmr.msra.gmra.mxu0 %v1125_v6  ;;  %1355 = vmatmul.bf16.vlgmr.msra.gmra.mxu2 %v1125_v6 }
  0xf4   :  { %v1018_v33 = vpop.f32.mrf.mxu0 }
  0xf5   :  { %v1032_v40 = vpop.f32.mrf.mxu1 }
  0xf6   :  { %v1033_v53 = vadd.f32 %v1032_v40, %v1018_v33  ;;  %v2633_v33 = vld [vmem:[#allocation8 + $0x54] sm:$0xf0]  ;;  %v2650_v40 = vld [vmem:[#allocation8 + $0xe4] sm:$0xf] }
  0xf7   :  { %v2369_v42 = vor.u32 %v2633_v33, %v2368_v32  ;;  %v2445_v45 = vor.u32 %v2650_v40, %v2442_v41  ;;  %v2330_v32 = vld [vmem:[#allocation8 + $0x8] sm:$0xf0]  ;;  %v2405_v40 = vor.u32 %v2640_v36, %v2402_v38  ;;  %v2392_v41 = vld [vmem:[#allocation8 + $0x80] sm:$0xf] }
  0xf8   :  { %v2333_v33 = vor.u32 %v2622_v30, %v2330_v32 }
  0xf9   :  { %1616 = vmatpush.bf16.msrb.mxu3 %v2445_v45  ;;  %1575 = vmatpush.bf16.msrb.mxu0 %v2369_v42  ;;  %v2639_v42 = vld [vmem:[#allocation8 + $0x84] sm:$0xf0]  ;;  %v2638_v45 = vld [vmem:[#allocation8 + $0x84] sm:$0xf] }
  0xfc   :  { %v1046_v49 = vpop.f32.mrf.mxu2  ;;  %v1020_v17 = vpop.f32.mrf.mxu0 }
  0xfd   :  { %v1060_v51 = vpop.f32.mrf.mxu3  ;;  %v1034_v52 = vpop.f32.mrf.mxu1  ;;  %v1047_v54 = vadd.f32 %v1046_v49, %v1033_v53  ;;  %v2432_v49 = vld [vmem:[#allocation8 + $0xd0] sm:$0xf]  ;;  %v2434_v53 = vld [vmem:[#allocation8 + $0xd8] sm:$0xf0] }
  0xfe   :  { %v1035_v10 = vadd.f32 %v1034_v52, %v1020_v17  ;;  %v2630_v17 = vld [vmem:[#allocation8 + $0x44] sm:$0xf]  ;;  %v2362_v52 = vld [vmem:[#allocation8 + $0x48] sm:$0xf0] }
  0xff   :  { %v1061_v55 = vadd.f32 %v1060_v51, %v1047_v54  ;;  %v2648_v51 = vld [vmem:[#allocation8 + $0xd4] sm:$0xf] }
 0x100   :  { %v2437_v54 = vor.u32 %v2648_v51, %v2434_v53 }
 0x102   :  { %1617 = vmatpush.bf16.msrb.mxu3 %v2437_v54 }
 0x104   :  { %v1048_v58 = vpop.f32.mrf.mxu2 }
 0x105   :  { %v1062_v39 = vpop.f32.mrf.mxu3  ;;  %v1049_v47 = vadd.f32 %v1048_v58, %v1035_v10  ;;  %v2433_v58 = vor.u32 %v2649_v50, %v2432_v49  ;;  %v2361_v10 = vor.u32 %v2631_v48, %v2360_v46  ;;  %v2393_v46 = vor.u32 %v2639_v42, %v2392_v41  ;;  %v2394_v48 = vld [vmem:[#allocation8 + $0x88] sm:$0xf0] }
 0x106   :  { %v2397_v1 = vor.u32 %v2638_v45, %v2394_v48 }
 0x107   :  { %v1063_v59 = vadd.f32 %v1062_v39, %v1049_v47  ;;  %v2365_v39 = vor.u32 %v2630_v17, %v2362_v52  ;;  %1589 = vmatpush.bf16.msrb.mxu1 %v2433_v58  ;;  %1576 = vmatpush.bf16.msrb.mxu0 %v2361_v10 }
 0x109   :  { %1604 = vmatpush.bf16.msrb.mxu2 %v2365_v39 }
 0x114   :  { %v1074_v44 = vpop.f32.mrf.mxu0 }
 0x115   :  { %v1088_v43 = vpop.f32.mrf.mxu1  ;;  %v1075_v56 = vadd.f32 %v1074_v44, %v1061_v55  ;;  %v2352_v44 = vld [vmem:[#allocation8 + $0x30] sm:$0xf]  ;;  %v2628_v55 = vld [vmem:[#allocation8 + $0x34] sm:$0xf] }
 0x117   :  { %v1089_v62 = vadd.f32 %v1088_v43, %v1075_v56  ;;  %v2629_v43 = vld [vmem:[#allocation8 + $0x34] sm:$0xf0]  ;;  %v2354_v56 = vld [vmem:[#allocation8 + $0x38] sm:$0xf0] }
 0x118   :  { %v2353_v47 = vor.u32 %v2629_v43, %v2352_v44 }
 0x11a   :  { %1577 = vmatpush.bf16.msrb.mxu0 %v2353_v47 }
 0x11c   :  { %v1102_v57 = vpop.f32.mrf.mxu2  ;;  %v1076_v61 = vpop.f32.mrf.mxu0 }
 0x11d   :  { %v1116_v60 = vpop.f32.mrf.mxu3  ;;  %v1077_v63 = vadd.f32 %v1076_v61, %v1063_v59  ;;  %v1103_v0 = vadd.f32 %v1102_v57, %v1089_v62  ;;  %v1090_v2 = vpop.f32.mrf.mxu1  ;;  %v2357_v57 = vor.u32 %v2628_v55, %v2354_v56  ;;  %v2424_v59 = vld [vmem:[#allocation8 + $0xc0] sm:$0xf]  ;;  %v2646_v61 = vld [vmem:[#allocation8 + $0xc4] sm:$0xf] }
 0x11f   :  { %v1091_v3 = vadd.f32 %v1090_v2, %v1077_v63  ;;  %v1117_v5 = vadd.f32 %v1116_v60, %v1103_v0  ;;  %v2647_v60 = vld [vmem:[#allocation8 + $0xc4] sm:$0xf0]  ;;  %v2426_v63 = vld [vmem:[#allocation8 + $0xc8] sm:$0xf0]  ;;  %1605 = vmatpush.bf16.msrb.mxu2 %v2357_v57  ;;  %v2344_v2 = vld [vmem:[#allocation8 + $0x20] sm:$0xf] }
 0x120   :  { %v2425_v62 = vor.u32 %v2647_v60, %v2424_v59  ;;  %v2429_v0 = vor.u32 %v2646_v61, %v2426_v63 }
 0x121   :  { %v1122_v9 = vmax.f32 %v1117_v5, 0.0 }
 0x122   :  { %1590 = vmatpush.bf16.msrb.mxu1 %v2425_v62  ;;  %1618 = vmatpush.bf16.msrb.mxu3 %v2429_v0 }
 0x124   :  { %v1104_v4 = vpop.f32.mrf.mxu2 }
 0x125   :  { %v1105_v6 = vadd.f32 %v1104_v4, %v1091_v3  ;;  %v1118_v7 = vpop.f32.mrf.mxu3  ;;  %v2627_v3 = vld [vmem:[#allocation8 + $0x24] sm:$0xf0]  ;;  %v2626_v4 = vld [vmem:[#allocation8 + $0x24] sm:$0xf] }
 0x126   :  { %v2345_v5 = vor.u32 %v2627_v3, %v2344_v2 }
 0x127   :  { %v1119_v8 = vadd.f32 %v1118_v7, %v1105_v6  ;;  %v2346_v6 = vld [vmem:[#allocation8 + $0x28] sm:$0xf0] }
 0x128   :  { %v2349_v7 = vor.u32 %v2626_v4, %v2346_v6  ;;  %1578 = vmatpush.bf16.msrb.mxu0 %v2345_v5 }
 0x129   :  { %v1124_v11 = vmax.f32 %v1119_v8, 0.0  ;;  %v2416_v8 = vld [vmem:[#allocation8 + $0xb0] sm:$0xf] }
 0x12a   :  { %1606 = vmatpush.bf16.msrb.mxu2 %v2349_v7 }
 0x12b   :  { %v1126_v12 = vpack.c.bf16 %v1124_v11, %v1122_v9  ;;  %v2645_v9 = vld [vmem:[#allocation8 + $0xb4] sm:$0xf0]  ;;  %v2644_v11 = vld [vmem:[#allocation8 + $0xb4] sm:$0xf] }
 0x12c   :  { %v2421_v14 = vor.u32 %v2644_v11, %v2418_v13  ;;  %1579 = vmatpush.bf16.msrb.mxu0 %v2337_v19 }
 0x12d   :  { %1341 = vmatmul.bf16.vlgmr.msra.gmra.mxu1 %v1126_v12  ;;  %1369 = vmatmul.bf16.vlgmr.msra.gmra.mxu3 %v1126_v12  ;;  %v2417_v12 = vor.u32 %v2645_v9, %v2416_v8 }
 0x12e   :  { %1619 = vmatpush.bf16.msrb.mxu3 %v2421_v14  ;;  %1607 = vmatpush.bf16.msrb.mxu2 %v2341_v21 }
 0x12f   :  { %1591 = vmatpush.bf16.msrb.mxu1 %v2417_v12 }
 0x130   :  { %1580 = vmatpush.bf16.msrb.mxu0 %v2329_v31 }
 0x132   :  { %1620 = vmatpush.bf16.msrb.mxu3 %v2413_v27  ;;  %1608 = vmatpush.bf16.msrb.mxu2 %v2333_v33 }
 0x133   :  { %1592 = vmatpush.bf16.msrb.mxu1 %v2409_v25 }
 0x136   :  { %1621 = vmatpush.bf16.msrb.mxu3 %v2405_v40 }
 0x137   :  { %1593 = vmatpush.bf16.msrb.mxu1 %v2401_v37 }
 0x13a   :  { %1622 = vmatpush.bf16.msrb.mxu3 %v2397_v1 }
 0x13b   :  { %1594 = vmatpush.bf16.msrb.mxu1 %v2393_v46 }
 0x16a   :  { %v1328_v49 = vpop.f32.mrf.mxu0 }
 0x170   :  { %v1356_v51 = vpop.f32.mrf.mxu2 }
 0x172   :  { %v1330_v53 = vpop.f32.mrf.mxu0 }
 0x178   :  { %v1358_v55 = vpop.f32.mrf.mxu2 }
 0x1aa   :  { %v1342_v50 = vpop.f32.mrf.mxu1 }
 0x1ab   :  { %v1343_v52 = vadd.f32 %v1342_v50, %v1328_v49 }
 0x1ad   :  { %v1375_v10 = vmax.f32 %v1343_v52, 0.0 }
 0x1b0   :  { %v1370_v17 = vpop.f32.mrf.mxu3 }
 0x1b1   :  { %v1371_v44 = vadd.f32 %v1370_v17, %v1356_v51 }
 0x1b2   :  { %v1344_v58 = vpop.f32.mrf.mxu1 }
 0x1b3   :  { %v1345_v54 = vadd.f32 %v1344_v58, %v1330_v53  ;;  %v1376_v57 = vmax.f32 %v1371_v44, 0.0 }
 0x1b5   :  { %v1377_v39 = vmax.f32 %v1345_v54, 0.0 }
 0x1b7   :  { %v1379_v43 = vpack.c.bf16 %v1377_v39, %v1375_v10 }
 0x1b8   :  { %v1372_v47 = vpop.f32.mrf.mxu3 }
 0x1b9   :  { %v1373_v56 = vadd.f32 %v1372_v47, %v1358_v55  ;;  %1581 = vmatmul.bf16.vlgmr.msrb.gmra.mxu0 %v1379_v43  ;;  %1609 = vmatmul.bf16.vlgmr.msrb.gmra.mxu2 %v1379_v43 }
 0x1bb   :  { %v1378_v59 = vmax.f32 %v1373_v56, 0.0 }
 0x1bd   :  { %v1380_v60 = vpack.c.bf16 %v1378_v59, %v1376_v57 }
 0x1bf   :  { %1595 = vmatmul.bf16.vlgmr.msrb.gmra.mxu1 %v1380_v60  ;;  %1623 = vmatmul.bf16.vlgmr.msrb.gmra.mxu3 %v1380_v60 }
 0x236   :  { %v1582_v61 = vpop.f32.mrf.mxu0 }
 0x23c   :  { %v1596_v62 = vpop.f32.mrf.mxu1  ;;  %v1610_v0 = vpop.f32.mrf.mxu2 }
 0x23d   :  { %v1597_v63 = vadd.f32 %v1596_v62, %v1582_v61 }
 0x23e   :  { %v1584_v4 = vpop.f32.mrf.mxu0 }
 0x23f   :  { %1629 = vst [vmem:[#allocation10] sm:$0xff] %v1597_v63 }
 0x242   :  { %v1624_v2 = vpop.f32.mrf.mxu3 }
 0x243   :  { %v1625_v3 = vadd.f32 %v1624_v2, %v1610_v0 }
 0x244   :  { %v1598_v5 = vpop.f32.mrf.mxu1  ;;  %v1612_v7 = vpop.f32.mrf.mxu2 }
 0x245   :  { %1630 = vst [vmem:[#allocation10 + $0x8] sm:$0xff] %v1625_v3  ;;  %v1599_v6 = vadd.f32 %v1598_v5, %v1584_v4 }
 0x247   :  { %1631 = vst [vmem:[#allocation10 + $0x10] sm:$0xff] %v1599_v6 }
 0x24a   :  { %v1626_v8 = vpop.f32.mrf.mxu3 }
 0x24b   :  { %v1627_v9 = vadd.f32 %v1626_v8, %v1612_v7 }
 0x24d   :  { %1632 = vst [vmem:[#allocation10 + $0x18] sm:$0xff] %v1627_v9 }
 0x24e   :  { %1636 = vsyncadd [#allocation4], 256  ;;  %s1639_s11 = sshll.u32 %s2880_s4, 4  ;;  %s2801_s12 = smov [#allocation10]   ;;  %s1640_s11 = int_to_ptr.hbm [resolvable:$true] %s1639_s11 }
 0x24f   :  { %s1637_s13 = sshll.u32 %s2801_s12, 4  ;;  %s2802_s14 = smov 256   ;;  %s1638_s13 = int_to_ptr.vmem [resolvable:$true] %s1637_s13 }
 0x250   :  { %s2803_s15 = smov 16  }
 0x251   :  { %1645 = dma.vmem_to_hbm [thread:$0]  %s1638_s13, 256, %s1640_s11, [#allocation4], %s2802_s14, %s2802_s14, %s2803_s15  }
 0x252   :  { %2791 = dma.done.wait [#allocation4], 512  }
 0x253   :  { %2792 = vsyncadd [#allocation4], 4294966784 }
 0x254   :  { %1650 = vsyncpa [#allocation3], 1 }
 0x255   :  { %1651 = vsyncpa [#allocation6], 1 }
 0x256   :  { %1652 = vsyncpa [#allocation9], 1 }
 0x257   :  { %1653 = vsyncpa [#allocation4], 1 }

</bundles_post_ra>
